<compile_context>
chip_gen: v5e
topology: v5e:2x2
jax: 0.10.0
libtpu: 0.0.40
codegen_flags: <defaults>
</compile_context>

<pallas_src>
import functools

import numpy as np

import jax
import jax.numpy as jnp
from jax import lax
from jax.experimental import pallas as pl
from jax.experimental.pallas import tpu as pltpu


_TAPS = [(dy, dx) for dy in (-1, 0, 1) for dx in (-1, 0, 1)]   # (ky,kx) order


def _mm(a, b):
    return lax.dot_general(a, b, (((1,), (0,)), ((), ())),
                           preferred_element_type=jnp.float32)


def _ceil8(n):
    return (n + 7) // 8 * 8


def _alloc_rows(entries):
    """Assign each named block an 8-aligned starting row in a slab."""
    lay, off = {}, 0
    for name, rows in entries:
        lay[name] = off
        off += _ceil8(rows)
    return lay, off


def cdfa_kernel(x_ref, m_ref, w_ref, o_ref, *, C, H, W, Bt, ML, WL):
    HW = H * W
    NPIX = Bt * HW
    C2 = C // 2

    def mrow(name, t=0, rows=1):                 # (rows, NPIX) mask-slab slice
        r0 = ML[name] + t
        return m_ref[r0:r0 + rows, :]

    def wblk(name, rows, cols):                  # (rows, cols) weight-slab slice
        r0 = WL[name]
        return w_ref[r0:r0 + rows, 0:cols]

    x = x_ref[...]                               # (C, NPIX) f32

    # ---- fused q/k/v 1x1 convs: one (3C, C) @ (C, NPIX) MXU matmul ---------
    qkv = _mm(wblk("wqkv", 3 * C, C), x) + wblk("bqkv", 3 * C, 1)
    q = qkv[0:C]
    k = qkv[C:2 * C]
    v = qkv[2 * C:3 * C]

    # ---- spatial branch: channel mean/max of q, 3x3 conv (2->1) -----------
    # No im2col / no (1,18) matmul: per-tap pltpu.roll + VPU FMAs against
    # weight-premultiplied boundary masks (built in the wrapper).
    avg_r = jnp.mean(q, axis=0, keepdims=True)   # (1, NPIX)
    max_r = jnp.max(q, axis=0, keepdims=True)    # (1, NPIX)
    am = jnp.concatenate([avg_r, max_r], axis=0)  # (2, NPIX)

    s_row = jnp.zeros((1, NPIX), jnp.float32)
    for t, (dy, dx) in enumerate(_TAPS):
        shift = (-(dy * W + dx)) % NPIX
        r = pltpu.roll(am, shift=shift, axis=1) if shift else am
        s_row = s_row + mrow("wamask", t) * r[0:1] + mrow("wmmask", t) * r[1:2]

    # ---- channel branch: per-image global avg/max pool of k + 1x1 MLP -----
    # Masks are precomputed (no iota/compares).  At large Bt switch the avg to
    # a single k @ pooling-matrix MXU matmul instead of this unrolled loop.
    inv_hw = 1.0 / HW
    avg_cols, max_cols = [], []
    for b in range(Bt):
        avg_cols.append(jnp.sum(k * mrow("imask", b), axis=1, keepdims=True)
                        * inv_hw)
        max_cols.append(jnp.max(k + mrow("ineg", b), axis=1, keepdims=True))
    cat = jnp.concatenate([jnp.concatenate(avg_cols, axis=1),
                           jnp.concatenate(max_cols, axis=1)], axis=0)  # (2C,Bt)
    h1 = jnp.maximum(_mm(wblk("wc1", C2, 2 * C), cat), 0.0)             # (C2,Bt)
    c_vec = _mm(wblk("wc2", C, C2), h1)                                 # (C, Bt)

    # ---- out[b] = c_vec[:, b] outer s[b, :]: one (C,Bt)@(Bt,NPIX) matmul ---
    out = _mm(c_vec, mrow("imask", 0, Bt)) * s_row                      # (C,NPIX)

    # ---- c4: split 1x1 conv (avoids sublane concat of v/out) + ReLU -------
    o4 = jnp.maximum(_mm(wblk("wc4v", C, C), v)
                     + _mm(wblk("wc4o", C, C), out)
                     + wblk("bc4", C, 1), 0.0)                          # (C,NPIX)

    # ---- c5: 3x3 conv as 9 per-tap (C,C)@(C,NPIX) matmuls ------------------
    o5 = jnp.zeros((C, NPIX), jnp.float32)
    for t, (dy, dx) in enumerate(_TAPS):
        shift = (-(dy * W + dx)) % NPIX
        r = pltpu.roll(o4, shift=shift, axis=1) if shift else o4
        if dy or dx:
            r = r * mrow("tmask", t)
        o5 = o5 + _mm(wblk(f"wc5_{t}", C, C), r)
    o5 = jnp.maximum(o5, 0.0)

    # ---- c6: 1x1 conv + sigmoid gate, multiply with input -----------------
    o6 = _mm(wblk("wc6", C, C), o5) + wblk("bc6", C, 1)
    o_ref[...] = x * jax.nn.sigmoid(o6)


def prepare_inputs(x_nchw, params, Bt):
    """One-time layout prep (XLA side): pixels-on-lanes input, mask slab,
    weight slab with 8-aligned row blocks."""
    B, C, H, W = x_nchw.shape
    HW = H * W
    NPIX = Bt * HW
    C2 = C // 2
    p = params

    # Pixels on lanes: (C, B*H*W), images contiguous along the lane axis.
    x2 = x_nchw.reshape(B, C, HW).transpose(1, 0, 2).reshape(C, B * HW)

    # ---------------- mask slab: (rows, NPIX) -------------------------------
    mlay, mrows = _alloc_rows([("tmask", 9), ("wamask", 9), ("wmmask", 9),
                               ("imask", Bt), ("ineg", Bt)])
    j = np.arange(NPIX)
    wi, hi = j % W, (j // W) % H
    tmask = np.stack([((hi + dy >= 0) & (hi + dy < H) &
                       (wi + dx >= 0) & (wi + dx < W)).astype(np.float32)
                      for dy, dx in _TAPS])                       # (9, NPIX)
    imask = np.zeros((Bt, NPIX), np.float32)
    for b in range(Bt):
        imask[b, b * HW:(b + 1) * HW] = 1.0
    ineg = (imask - 1.0) * 1e30           # 0 inside the image, -1e30 outside

    w1r = p["w1"].reshape(9, 2)           # tap-major (ky,kx); ch0=avg, ch1=max
    tmask_j = jnp.asarray(tmask)
    mslab = jnp.zeros((mrows, NPIX), jnp.float32)
    mslab = mslab.at[mlay["tmask"]:mlay["tmask"] + 9].set(tmask_j)
    mslab = mslab.at[mlay["wamask"]:mlay["wamask"] + 9].set(tmask_j * w1r[:, 0:1])
    mslab = mslab.at[mlay["wmmask"]:mlay["wmmask"] + 9].set(tmask_j * w1r[:, 1:2])
    mslab = mslab.at[mlay["imask"]:mlay["imask"] + Bt].set(jnp.asarray(imask))
    mslab = mslab.at[mlay["ineg"]:mlay["ineg"] + Bt].set(jnp.asarray(ineg))

    # ---------------- weight slab: (rows, 128) ------------------------------
    wl_entries = [("wqkv", 3 * C), ("bqkv", 3 * C), ("wc1", C2), ("wc2", C),
                  ("wc4v", C), ("wc4o", C), ("bc4", C), ("wc6", C), ("bc6", C)]
    wl_entries += [(f"wc5_{t}", C) for t in range(9)]
    wlay, wrows = _alloc_rows(wl_entries)

    WCOLS = 128
    assert 2 * C <= WCOLS, "weight slab width too small for this C"
    pieces = {
        "wqkv": jnp.concatenate([p["wq"].T, p["wk"].T, p["wv"].T], axis=0),
        "bqkv": jnp.concatenate([p["bq"], p["bk"], p["bv"]],
                                axis=1).reshape(3 * C, 1),
        "wc1": p["wc1"].T,
        "wc2": p["wc2"].T,
        "wc4v": p["wc4"][:C, :].T,
        "wc4o": p["wc4"][C:, :].T,
        "bc4": p["bc4"].T,
        "wc6": p["wc6"].T,
        "bc6": p["bc6"].T,
    }
    for t, (dy, dx) in enumerate(_TAPS):
        pieces[f"wc5_{t}"] = p["wc5"][dy + 1, dx + 1].T          # (Cout, Cin)
    wslab = jnp.zeros((wrows, WCOLS), jnp.float32)
    for name, arr in pieces.items():
        r, c = arr.shape
        wslab = wslab.at[wlay[name]:wlay[name] + r, 0:c].set(arr)

    return x2, mslab, wslab, mlay, wlay


def cdfa_pallas(x_nchw, params, *, images_per_step=None):
    B, C, H, W = x_nchw.shape
    HW = H * W
    # Default: all images in one grid step (v5e/v6e: 1 TensorCore, splitting
    # only adds per-step overhead).  On v7x set images_per_step=B//2 so the
    # "parallel" batch axis actually feeds both TensorCores.
    Bt = B if images_per_step is None else images_per_step
    assert B % Bt == 0, "batch must be divisible by images_per_step"
    npix = Bt * HW

    x2, mslab, wslab, mlay, wlay = prepare_inputs(x_nchw, params, Bt)

    kernel = functools.partial(cdfa_kernel, C=C, H=H, W=W, Bt=Bt,
                               ML=mlay, WL=wlay)

    out2 = pl.pallas_call(
        kernel,
        out_shape=jax.ShapeDtypeStruct((C, B * HW), jnp.float32),
        grid=(B // Bt,),
        in_specs=[
            pl.BlockSpec((C, npix), lambda i: (0, i)),
            pl.BlockSpec(mslab.shape, lambda i: (0, 0)),
            pl.BlockSpec(wslab.shape, lambda i: (0, 0)),
        ],
        out_specs=pl.BlockSpec((C, npix), lambda i: (0, i)),
        compiler_params=pltpu.CompilerParams(
            dimension_semantics=("parallel",)),
    )(x2, mslab, wslab)

    return out2.reshape(C, B, HW).transpose(1, 0, 2).reshape(B, C, H, W)


def init_params(key, C):
    assert C % 2 == 0
    C2 = C // 2
    ks = jax.random.split(key, 14)

    def n(k, shape, scale=0.3):
        return (scale * jax.random.normal(k, shape)).astype(jnp.float32)

    return {
        "wq": n(ks[0], (C, C)),  "bq": n(ks[1], (1, C)),
        "wk": n(ks[2], (C, C)),  "bk": n(ks[3], (1, C)),
        "wv": n(ks[4], (C, C)),  "bv": n(ks[5], (1, C)),
        "w1": n(ks[6], (3, 3, 2)),
        "wc1": n(ks[7], (2 * C, C2)),
        "wc2": n(ks[8], (C2, C)),
        "wc4": n(ks[9], (2 * C, C)), "bc4": n(ks[10], (1, C)),
        "wc5": n(ks[11], (3, 3, C, C)),
        "wc6": n(ks[12], (C, C)), "bc6": n(ks[13], (1, C)),
    }


def cdfa_reference(x, p):
    """Pure-JAX (lax.conv) NHWC reference used only for a sanity check."""
    dn = ("NHWC", "HWIO", "NHWC")

    def conv1x1(a, w, b=None):
        y = jax.lax.conv_general_dilated(a, w[None, None], (1, 1), "VALID",
                                         dimension_numbers=dn)
        return y if b is None else y + b.reshape(1, 1, 1, -1)

    def conv3x3(a, w):
        return jax.lax.conv_general_dilated(a, w, (1, 1), "SAME",
                                            dimension_numbers=dn)

    q = conv1x1(x, p["wq"], p["bq"])
    k = conv1x1(x, p["wk"], p["bk"])
    v = conv1x1(x, p["wv"], p["bv"])
    avg = jnp.mean(q, axis=-1, keepdims=True)
    mx = jnp.max(q, axis=-1, keepdims=True)
    s = conv3x3(jnp.concatenate([avg, mx], axis=-1), p["w1"][..., None])
    c_avg = jnp.mean(k, axis=(1, 2), keepdims=True)
    c_max = jnp.max(k, axis=(1, 2), keepdims=True)
    c = jnp.concatenate([c_avg, c_max], axis=-1)
    c = conv1x1(jax.nn.relu(conv1x1(c, p["wc1"])), p["wc2"])
    out = s * c
    out = jax.nn.relu(conv1x1(jnp.concatenate([v, out], axis=-1),
                              p["wc4"], p["bc4"]))
    out = jax.nn.relu(conv3x3(out, p["wc5"]))
    out = jax.nn.sigmoid(conv1x1(out, p["wc6"], p["bc6"]))
    return x * out


if __name__ == "__main__":
    B, C, H, W = 2, 4, 16, 16
    key = jax.random.PRNGKey(0)
    kx, kp = jax.random.split(key)

    # Inputs follow the PyTorch NCHW convention.
    x_nchw = jax.random.normal(kx, (B, C, H, W), dtype=jnp.float32)
    params = init_params(kp, C)

    out = cdfa_pallas(x_nchw, params)
    out = jax.block_until_ready(out)

    x_nhwc = jnp.transpose(x_nchw, (0, 2, 3, 1))
    ref = jnp.transpose(cdfa_reference(x_nhwc, params), (0, 3, 1, 2))
    assert out.shape == (B, C, H, W)
    assert jnp.allclose(out, ref, atol=5e-3, rtol=5e-3), \
        float(jnp.max(jnp.abs(out - ref)))
    print("KERNEL_OK")
</pallas_src>

<mosaic_0001>
module attributes {stable_mosaic.version = 11 : i64} {
  func.func @cdfa_kernel(%arg0: i32, %arg1: memref<4x512xf32, #tpu.memory_space<vmem>>, %arg2: memref<64x512xf32, #tpu.memory_space<vmem>>, %arg3: memref<160x128xf32, #tpu.memory_space<vmem>>, %arg4: memref<4x512xf32, #tpu.memory_space<vmem>>) attributes {dimension_semantics = [#tpu.dimension_semantics<parallel>], iteration_bounds = array<i64: 1>, scalar_prefetch = 0 : i64, scratch_operands = 0 : i64, tpu.core_type = #tpu.core_type<tc>, window_params = [{transform_indices = @transform_0, window_bounds = array<i64: 4, 512>}, {pipeline_mode = #tpu.pipeline_mode<synchronous>, transform_indices = @transform_1, window_bounds = array<i64: 64, 512>}, {pipeline_mode = #tpu.pipeline_mode<synchronous>, transform_indices = @transform_2, window_bounds = array<i64: 160, 128>}, {transform_indices = @transform_3, window_bounds = array<i64: 4, 512>}]} {
    %c0 = arith.constant 0 : index
    %c0_0 = arith.constant 0 : index
    %0 = vector.load %arg1[%c0, %c0_0] : memref<4x512xf32, #tpu.memory_space<vmem>>, vector<4x512xf32>
    %c0_1 = arith.constant 0 : index
    %c0_2 = arith.constant 0 : index
    %1 = vector.load %arg3[%c0_1, %c0_2] : memref<160x128xf32, #tpu.memory_space<vmem>>, vector<12x4xf32>
    %cst = arith.constant dense<0.000000e+00> : vector<12x512xf32>
    %2 = tpu.matmul %1, %0, %cst {dimension_numbers = #tpu.dot_dimension_numbers<[1], [0], [0], [1], [0, 0, 1, 1], [], []>} : vector<12x4xf32>, vector<4x512xf32>, vector<12x512xf32> -> vector<12x512xf32>
    %c16 = arith.constant 16 : index
    %c0_3 = arith.constant 0 : index
    %3 = vector.load %arg3[%c16, %c0_3] : memref<160x128xf32, #tpu.memory_space<vmem>>, vector<12x1xf32>
    %4 = vector.broadcast %3 : vector<12x1xf32> to vector<12x512xf32>
    %5 = arith.addf %2, %4 : vector<12x512xf32>
    %6 = vector.extract_strided_slice %5 {offsets = [0, 0], sizes = [4, 512], strides = [1, 1]} : vector<12x512xf32> to vector<4x512xf32>
    %7 = vector.extract_strided_slice %5 {offsets = [4, 0], sizes = [4, 512], strides = [1, 1]} : vector<12x512xf32> to vector<4x512xf32>
    %8 = vector.extract_strided_slice %5 {offsets = [8, 0], sizes = [4, 512], strides = [1, 1]} : vector<12x512xf32> to vector<4x512xf32>
    %cst_4 = arith.constant dense<0.000000e+00> : vector<512xf32>
    %9 = vector.multi_reduction <add>, %6, %cst_4 [0] : vector<4x512xf32> to vector<512xf32>
    %10 = vector.shape_cast %9 : vector<512xf32> to vector<1x512xf32>
    %cst_5 = arith.constant 4.000000e+00 : f32
    %11 = vector.broadcast %cst_5 : f32 to vector<1x512xf32>
    %12 = arith.divf %10, %11 : vector<1x512xf32>
    %cst_6 = arith.constant dense<0xFF800000> : vector<512xf32>
    %13 = vector.multi_reduction <maximumf>, %6, %cst_6 [0] : vector<4x512xf32> to vector<512xf32>
    %14 = vector.shape_cast %13 : vector<512xf32> to vector<1x512xf32>
    %15 = tpu.concatenate %12, %14 in 0 : vector<1x512xf32>, vector<1x512xf32> -> vector<2x512xf32>
    %cst_7 = arith.constant 0.000000e+00 : f32
    %16 = vector.broadcast %cst_7 : f32 to vector<1x512xf32>
    %c17_i32 = arith.constant 17 : i32
    %17 = tpu.dynamic_rotate %15 by %c17_i32 dim 1 : vector<2x512xf32>, i32 -> vector<2x512xf32>
    %c16_8 = arith.constant 16 : index
    %c0_9 = arith.constant 0 : index
    %18 = vector.load %arg2[%c16_8, %c0_9] : memref<64x512xf32, #tpu.memory_space<vmem>>, vector<1x512xf32>
    %19 = vector.extract_strided_slice %17 {offsets = [0, 0], sizes = [1, 512], strides = [1, 1]} : vector<2x512xf32> to vector<1x512xf32>
    %20 = arith.mulf %18, %19 : vector<1x512xf32>
    %21 = arith.addf %16, %20 : vector<1x512xf32>
    %c32 = arith.constant 32 : index
    %c0_10 = arith.constant 0 : index
    %22 = vector.load %arg2[%c32, %c0_10] : memref<64x512xf32, #tpu.memory_space<vmem>>, vector<1x512xf32>
    %23 = vector.extract_strided_slice %17 {offsets = [1, 0], sizes = [1, 512], strides = [1, 1]} : vector<2x512xf32> to vector<1x512xf32>
    %24 = arith.mulf %22, %23 : vector<1x512xf32>
    %25 = arith.addf %21, %24 : vector<1x512xf32>
    %c16_i32 = arith.constant 16 : i32
    %26 = tpu.dynamic_rotate %15 by %c16_i32 dim 1 : vector<2x512xf32>, i32 -> vector<2x512xf32>
    %c17 = arith.constant 17 : index
    %c0_11 = arith.constant 0 : index
    %27 = vector.load %arg2[%c17, %c0_11] : memref<64x512xf32, #tpu.memory_space<vmem>>, vector<1x512xf32>
    %28 = vector.extract_strided_slice %26 {offsets = [0, 0], sizes = [1, 512], strides = [1, 1]} : vector<2x512xf32> to vector<1x512xf32>
    %29 = arith.mulf %27, %28 : vector<1x512xf32>
    %30 = arith.addf %25, %29 : vector<1x512xf32>
    %c33 = arith.constant 33 : index
    %c0_12 = arith.constant 0 : index
    %31 = vector.load %arg2[%c33, %c0_12] : memref<64x512xf32, #tpu.memory_space<vmem>>, vector<1x512xf32>
    %32 = vector.extract_strided_slice %26 {offsets = [1, 0], sizes = [1, 512], strides = [1, 1]} : vector<2x512xf32> to vector<1x512xf32>
    %33 = arith.mulf %31, %32 : vector<1x512xf32>
    %34 = arith.addf %30, %33 : vector<1x512xf32>
    %c15_i32 = arith.constant 15 : i32
    %35 = tpu.dynamic_rotate %15 by %c15_i32 dim 1 : vector<2x512xf32>, i32 -> vector<2x512xf32>
    %c18 = arith.constant 18 : index
    %c0_13 = arith.constant 0 : index
    %36 = vector.load %arg2[%c18, %c0_13] : memref<64x512xf32, #tpu.memory_space<vmem>>, vector<1x512xf32>
    %37 = vector.extract_strided_slice %35 {offsets = [0, 0], sizes = [1, 512], strides = [1, 1]} : vector<2x512xf32> to vector<1x512xf32>
    %38 = arith.mulf %36, %37 : vector<1x512xf32>
    %39 = arith.addf %34, %38 : vector<1x512xf32>
    %c34 = arith.constant 34 : index
    %c0_14 = arith.constant 0 : index
    %40 = vector.load %arg2[%c34, %c0_14] : memref<64x512xf32, #tpu.memory_space<vmem>>, vector<1x512xf32>
    %41 = vector.extract_strided_slice %35 {offsets = [1, 0], sizes = [1, 512], strides = [1, 1]} : vector<2x512xf32> to vector<1x512xf32>
    %42 = arith.mulf %40, %41 : vector<1x512xf32>
    %43 = arith.addf %39, %42 : vector<1x512xf32>
    %c1_i32 = arith.constant 1 : i32
    %44 = tpu.dynamic_rotate %15 by %c1_i32 dim 1 : vector<2x512xf32>, i32 -> vector<2x512xf32>
    %c19 = arith.constant 19 : index
    %c0_15 = arith.constant 0 : index
    %45 = vector.load %arg2[%c19, %c0_15] : memref<64x512xf32, #tpu.memory_space<vmem>>, vector<1x512xf32>
    %46 = vector.extract_strided_slice %44 {offsets = [0, 0], sizes = [1, 512], strides = [1, 1]} : vector<2x512xf32> to vector<1x512xf32>
    %47 = arith.mulf %45, %46 : vector<1x512xf32>
    %48 = arith.addf %43, %47 : vector<1x512xf32>
    %c35 = arith.constant 35 : index
    %c0_16 = arith.constant 0 : index
    %49 = vector.load %arg2[%c35, %c0_16] : memref<64x512xf32, #tpu.memory_space<vmem>>, vector<1x512xf32>
    %50 = vector.extract_strided_slice %44 {offsets = [1, 0], sizes = [1, 512], strides = [1, 1]} : vector<2x512xf32> to vector<1x512xf32>
    %51 = arith.mulf %49, %50 : vector<1x512xf32>
    %52 = arith.addf %48, %51 : vector<1x512xf32>
    %c20 = arith.constant 20 : index
    %c0_17 = arith.constant 0 : index
    %53 = vector.load %arg2[%c20, %c0_17] : memref<64x512xf32, #tpu.memory_space<vmem>>, vector<1x512xf32>
    %54 = vector.extract_strided_slice %15 {offsets = [0, 0], sizes = [1, 512], strides = [1, 1]} : vector<2x512xf32> to vector<1x512xf32>
    %55 = arith.mulf %53, %54 : vector<1x512xf32>
    %56 = arith.addf %52, %55 : vector<1x512xf32>
    %c36 = arith.constant 36 : index
    %c0_18 = arith.constant 0 : index
    %57 = vector.load %arg2[%c36, %c0_18] : memref<64x512xf32, #tpu.memory_space<vmem>>, vector<1x512xf32>
    %58 = vector.extract_strided_slice %15 {offsets = [1, 0], sizes = [1, 512], strides = [1, 1]} : vector<2x512xf32> to vector<1x512xf32>
    %59 = arith.mulf %57, %58 : vector<1x512xf32>
    %60 = arith.addf %56, %59 : vector<1x512xf32>
    %c511_i32 = arith.constant 511 : i32
    %61 = tpu.dynamic_rotate %15 by %c511_i32 dim 1 : vector<2x512xf32>, i32 -> vector<2x512xf32>
    %c21 = arith.constant 21 : index
    %c0_19 = arith.constant 0 : index
    %62 = vector.load %arg2[%c21, %c0_19] : memref<64x512xf32, #tpu.memory_space<vmem>>, vector<1x512xf32>
    %63 = vector.extract_strided_slice %61 {offsets = [0, 0], sizes = [1, 512], strides = [1, 1]} : vector<2x512xf32> to vector<1x512xf32>
    %64 = arith.mulf %62, %63 : vector<1x512xf32>
    %65 = arith.addf %60, %64 : vector<1x512xf32>
    %c37 = arith.constant 37 : index
    %c0_20 = arith.constant 0 : index
    %66 = vector.load %arg2[%c37, %c0_20] : memref<64x512xf32, #tpu.memory_space<vmem>>, vector<1x512xf32>
    %67 = vector.extract_strided_slice %61 {offsets = [1, 0], sizes = [1, 512], strides = [1, 1]} : vector<2x512xf32> to vector<1x512xf32>
    %68 = arith.mulf %66, %67 : vector<1x512xf32>
    %69 = arith.addf %65, %68 : vector<1x512xf32>
    %c497_i32 = arith.constant 497 : i32
    %70 = tpu.dynamic_rotate %15 by %c497_i32 dim 1 : vector<2x512xf32>, i32 -> vector<2x512xf32>
    %c22 = arith.constant 22 : index
    %c0_21 = arith.constant 0 : index
    %71 = vector.load %arg2[%c22, %c0_21] : memref<64x512xf32, #tpu.memory_space<vmem>>, vector<1x512xf32>
    %72 = vector.extract_strided_slice %70 {offsets = [0, 0], sizes = [1, 512], strides = [1, 1]} : vector<2x512xf32> to vector<1x512xf32>
    %73 = arith.mulf %71, %72 : vector<1x512xf32>
    %74 = arith.addf %69, %73 : vector<1x512xf32>
    %c38 = arith.constant 38 : index
    %c0_22 = arith.constant 0 : index
    %75 = vector.load %arg2[%c38, %c0_22] : memref<64x512xf32, #tpu.memory_space<vmem>>, vector<1x512xf32>
    %76 = vector.extract_strided_slice %70 {offsets = [1, 0], sizes = [1, 512], strides = [1, 1]} : vector<2x512xf32> to vector<1x512xf32>
    %77 = arith.mulf %75, %76 : vector<1x512xf32>
    %78 = arith.addf %74, %77 : vector<1x512xf32>
    %c496_i32 = arith.constant 496 : i32
    %79 = tpu.dynamic_rotate %15 by %c496_i32 dim 1 : vector<2x512xf32>, i32 -> vector<2x512xf32>
    %c23 = arith.constant 23 : index
    %c0_23 = arith.constant 0 : index
    %80 = vector.load %arg2[%c23, %c0_23] : memref<64x512xf32, #tpu.memory_space<vmem>>, vector<1x512xf32>
    %81 = vector.extract_strided_slice %79 {offsets = [0, 0], sizes = [1, 512], strides = [1, 1]} : vector<2x512xf32> to vector<1x512xf32>
    %82 = arith.mulf %80, %81 : vector<1x512xf32>
    %83 = arith.addf %78, %82 : vector<1x512xf32>
    %c39 = arith.constant 39 : index
    %c0_24 = arith.constant 0 : index
    %84 = vector.load %arg2[%c39, %c0_24] : memref<64x512xf32, #tpu.memory_space<vmem>>, vector<1x512xf32>
    %85 = vector.extract_strided_slice %79 {offsets = [1, 0], sizes = [1, 512], strides = [1, 1]} : vector<2x512xf32> to vector<1x512xf32>
    %86 = arith.mulf %84, %85 : vector<1x512xf32>
    %87 = arith.addf %83, %86 : vector<1x512xf32>
    %c495_i32 = arith.constant 495 : i32
    %88 = tpu.dynamic_rotate %15 by %c495_i32 dim 1 : vector<2x512xf32>, i32 -> vector<2x512xf32>
    %c24 = arith.constant 24 : index
    %c0_25 = arith.constant 0 : index
    %89 = vector.load %arg2[%c24, %c0_25] : memref<64x512xf32, #tpu.memory_space<vmem>>, vector<1x512xf32>
    %90 = vector.extract_strided_slice %88 {offsets = [0, 0], sizes = [1, 512], strides = [1, 1]} : vector<2x512xf32> to vector<1x512xf32>
    %91 = arith.mulf %89, %90 : vector<1x512xf32>
    %92 = arith.addf %87, %91 : vector<1x512xf32>
    %c40 = arith.constant 40 : index
    %c0_26 = arith.constant 0 : index
    %93 = vector.load %arg2[%c40, %c0_26] : memref<64x512xf32, #tpu.memory_space<vmem>>, vector<1x512xf32>
    %94 = vector.extract_strided_slice %88 {offsets = [1, 0], sizes = [1, 512], strides = [1, 1]} : vector<2x512xf32> to vector<1x512xf32>
    %95 = arith.mulf %93, %94 : vector<1x512xf32>
    %96 = arith.addf %92, %95 : vector<1x512xf32>
    %c48 = arith.constant 48 : index
    %c0_27 = arith.constant 0 : index
    %97 = vector.load %arg2[%c48, %c0_27] : memref<64x512xf32, #tpu.memory_space<vmem>>, vector<1x512xf32>
    %98 = vector.broadcast %97 : vector<1x512xf32> to vector<4x512xf32>
    %99 = arith.mulf %7, %98 : vector<4x512xf32>
    %cst_28 = arith.constant dense<0.000000e+00> : vector<4xf32>
    %100 = vector.multi_reduction <add>, %99, %cst_28 [1] : vector<4x512xf32> to vector<4xf32>
    %101 = vector.shape_cast %100 : vector<4xf32> to vector<4x1xf32>
    %cst_29 = arith.constant 3.906250e-03 : f32
    %102 = vector.broadcast %cst_29 : f32 to vector<4x1xf32>
    %103 = arith.mulf %101, %102 : vector<4x1xf32>
    %c56 = arith.constant 56 : index
    %c0_30 = arith.constant 0 : index
    %104 = vector.load %arg2[%c56, %c0_30] : memref<64x512xf32, #tpu.memory_space<vmem>>, vector<1x512xf32>
    %105 = vector.broadcast %104 : vector<1x512xf32> to vector<4x512xf32>
    %106 = arith.addf %7, %105 : vector<4x512xf32>
    %cst_31 = arith.constant dense<0xFF800000> : vector<4xf32>
    %107 = vector.multi_reduction <maximumf>, %106, %cst_31 [1] : vector<4x512xf32> to vector<4xf32>
    %108 = vector.shape_cast %107 : vector<4xf32> to vector<4x1xf32>
    %c49 = arith.constant 49 : index
    %c0_32 = arith.constant 0 : index
    %109 = vector.load %arg2[%c49, %c0_32] : memref<64x512xf32, #tpu.memory_space<vmem>>, vector<1x512xf32>
    %110 = vector.broadcast %109 : vector<1x512xf32> to vector<4x512xf32>
    %111 = arith.mulf %7, %110 : vector<4x512xf32>
    %cst_33 = arith.constant dense<0.000000e+00> : vector<4xf32>
    %112 = vector.multi_reduction <add>, %111, %cst_33 [1] : vector<4x512xf32> to vector<4xf32>
    %113 = vector.shape_cast %112 : vector<4xf32> to vector<4x1xf32>
    %cst_34 = arith.constant 3.906250e-03 : f32
    %114 = vector.broadcast %cst_34 : f32 to vector<4x1xf32>
    %115 = arith.mulf %113, %114 : vector<4x1xf32>
    %c57 = arith.constant 57 : index
    %c0_35 = arith.constant 0 : index
    %116 = vector.load %arg2[%c57, %c0_35] : memref<64x512xf32, #tpu.memory_space<vmem>>, vector<1x512xf32>
    %117 = vector.broadcast %116 : vector<1x512xf32> to vector<4x512xf32>
    %118 = arith.addf %7, %117 : vector<4x512xf32>
    %cst_36 = arith.constant dense<0xFF800000> : vector<4xf32>
    %119 = vector.multi_reduction <maximumf>, %118, %cst_36 [1] : vector<4x512xf32> to vector<4xf32>
    %120 = vector.shape_cast %119 : vector<4xf32> to vector<4x1xf32>
    %121 = tpu.concatenate %103, %115 in 1 : vector<4x1xf32>, vector<4x1xf32> -> vector<4x2xf32>
    %122 = tpu.concatenate %108, %120 in 1 : vector<4x1xf32>, vector<4x1xf32> -> vector<4x2xf32>
    %123 = tpu.concatenate %121, %122 in 0 : vector<4x2xf32>, vector<4x2xf32> -> vector<8x2xf32>
    %c32_37 = arith.constant 32 : index
    %c0_38 = arith.constant 0 : index
    %124 = vector.load %arg3[%c32_37, %c0_38] : memref<160x128xf32, #tpu.memory_space<vmem>>, vector<2x8xf32>
    %cst_39 = arith.constant dense<0.000000e+00> : vector<2x2xf32>
    %125 = tpu.matmul %124, %123, %cst_39 {dimension_numbers = #tpu.dot_dimension_numbers<[1], [0], [0], [1], [0, 0, 1, 1], [], []>} : vector<2x8xf32>, vector<8x2xf32>, vector<2x2xf32> -> vector<2x2xf32>
    %cst_40 = arith.constant 0.000000e+00 : f32
    %126 = vector.broadcast %cst_40 : f32 to vector<2x2xf32>
    %127 = arith.maximumf %125, %126 : vector<2x2xf32>
    %c40_41 = arith.constant 40 : index
    %c0_42 = arith.constant 0 : index
    %128 = vector.load %arg3[%c40_41, %c0_42] : memref<160x128xf32, #tpu.memory_space<vmem>>, vector<4x2xf32>
    %cst_43 = arith.constant dense<0.000000e+00> : vector<4x2xf32>
    %129 = tpu.matmul %128, %127, %cst_43 {dimension_numbers = #tpu.dot_dimension_numbers<[1], [0], [0], [1], [0, 0, 1, 1], [], []>} : vector<4x2xf32>, vector<2x2xf32>, vector<4x2xf32> -> vector<4x2xf32>
    %c48_44 = arith.constant 48 : index
    %c0_45 = arith.constant 0 : index
    %130 = vector.load %arg2[%c48_44, %c0_45] : memref<64x512xf32, #tpu.memory_space<vmem>>, vector<2x512xf32>
    %cst_46 = arith.constant dense<0.000000e+00> : vector<4x512xf32>
    %131 = tpu.matmul %129, %130, %cst_46 {dimension_numbers = #tpu.dot_dimension_numbers<[1], [0], [0], [1], [0, 0, 1, 1], [], []>} : vector<4x2xf32>, vector<2x512xf32>, vector<4x512xf32> -> vector<4x512xf32>
    %132 = vector.broadcast %96 : vector<1x512xf32> to vector<4x512xf32>
    %133 = arith.mulf %131, %132 : vector<4x512xf32>
    %c48_47 = arith.constant 48 : index
    %c0_48 = arith.constant 0 : index
    %134 = vector.load %arg3[%c48_47, %c0_48] : memref<160x128xf32, #tpu.memory_space<vmem>>, vector<4x4xf32>
    %cst_49 = arith.constant dense<0.000000e+00> : vector<4x512xf32>
    %135 = tpu.matmul %134, %8, %cst_49 {dimension_numbers = #tpu.dot_dimension_numbers<[1], [0], [0], [1], [0, 0, 1, 1], [], []>} : vector<4x4xf32>, vector<4x512xf32>, vector<4x512xf32> -> vector<4x512xf32>
    %c56_50 = arith.constant 56 : index
    %c0_51 = arith.constant 0 : index
    %136 = vector.load %arg3[%c56_50, %c0_51] : memref<160x128xf32, #tpu.memory_space<vmem>>, vector<4x4xf32>
    %cst_52 = arith.constant dense<0.000000e+00> : vector<4x512xf32>
    %137 = tpu.matmul %136, %133, %cst_52 {dimension_numbers = #tpu.dot_dimension_numbers<[1], [0], [0], [1], [0, 0, 1, 1], [], []>} : vector<4x4xf32>, vector<4x512xf32>, vector<4x512xf32> -> vector<4x512xf32>
    %138 = arith.addf %135, %137 : vector<4x512xf32>
    %c64 = arith.constant 64 : index
    %c0_53 = arith.constant 0 : index
    %139 = vector.load %arg3[%c64, %c0_53] : memref<160x128xf32, #tpu.memory_space<vmem>>, vector<4x1xf32>
    %140 = vector.broadcast %139 : vector<4x1xf32> to vector<4x512xf32>
    %141 = arith.addf %138, %140 : vector<4x512xf32>
    %cst_54 = arith.constant 0.000000e+00 : f32
    %142 = vector.broadcast %cst_54 : f32 to vector<4x512xf32>
    %143 = arith.maximumf %141, %142 : vector<4x512xf32>
    %cst_55 = arith.constant 0.000000e+00 : f32
    %144 = vector.broadcast %cst_55 : f32 to vector<4x512xf32>
    %c17_i32_56 = arith.constant 17 : i32
    %145 = tpu.dynamic_rotate %143 by %c17_i32_56 dim 1 : vector<4x512xf32>, i32 -> vector<4x512xf32>
    %c0_57 = arith.constant 0 : index
    %c0_58 = arith.constant 0 : index
    %146 = vector.load %arg2[%c0_57, %c0_58] : memref<64x512xf32, #tpu.memory_space<vmem>>, vector<1x512xf32>
    %147 = vector.broadcast %146 : vector<1x512xf32> to vector<4x512xf32>
    %148 = arith.mulf %145, %147 : vector<4x512xf32>
    %c88 = arith.constant 88 : index
    %c0_59 = arith.constant 0 : index
    %149 = vector.load %arg3[%c88, %c0_59] : memref<160x128xf32, #tpu.memory_space<vmem>>, vector<4x4xf32>
    %cst_60 = arith.constant dense<0.000000e+00> : vector<4x512xf32>
    %150 = tpu.matmul %149, %148, %cst_60 {dimension_numbers = #tpu.dot_dimension_numbers<[1], [0], [0], [1], [0, 0, 1, 1], [], []>} : vector<4x4xf32>, vector<4x512xf32>, vector<4x512xf32> -> vector<4x512xf32>
    %151 = arith.addf %144, %150 : vector<4x512xf32>
    %c16_i32_61 = arith.constant 16 : i32
    %152 = tpu.dynamic_rotate %143 by %c16_i32_61 dim 1 : vector<4x512xf32>, i32 -> vector<4x512xf32>
    %c1 = arith.constant 1 : index
    %c0_62 = arith.constant 0 : index
    %153 = vector.load %arg2[%c1, %c0_62] : memref<64x512xf32, #tpu.memory_space<vmem>>, vector<1x512xf32>
    %154 = vector.broadcast %153 : vector<1x512xf32> to vector<4x512xf32>
    %155 = arith.mulf %152, %154 : vector<4x512xf32>
    %c96 = arith.constant 96 : index
    %c0_63 = arith.constant 0 : index
    %156 = vector.load %arg3[%c96, %c0_63] : memref<160x128xf32, #tpu.memory_space<vmem>>, vector<4x4xf32>
    %cst_64 = arith.constant dense<0.000000e+00> : vector<4x512xf32>
    %157 = tpu.matmul %156, %155, %cst_64 {dimension_numbers = #tpu.dot_dimension_numbers<[1], [0], [0], [1], [0, 0, 1, 1], [], []>} : vector<4x4xf32>, vector<4x512xf32>, vector<4x512xf32> -> vector<4x512xf32>
    %158 = arith.addf %151, %157 : vector<4x512xf32>
    %c15_i32_65 = arith.constant 15 : i32
    %159 = tpu.dynamic_rotate %143 by %c15_i32_65 dim 1 : vector<4x512xf32>, i32 -> vector<4x512xf32>
    %c2 = arith.constant 2 : index
    %c0_66 = arith.constant 0 : index
    %160 = vector.load %arg2[%c2, %c0_66] : memref<64x512xf32, #tpu.memory_space<vmem>>, vector<1x512xf32>
    %161 = vector.broadcast %160 : vector<1x512xf32> to vector<4x512xf32>
    %162 = arith.mulf %159, %161 : vector<4x512xf32>
    %c104 = arith.constant 104 : index
    %c0_67 = arith.constant 0 : index
    %163 = vector.load %arg3[%c104, %c0_67] : memref<160x128xf32, #tpu.memory_space<vmem>>, vector<4x4xf32>
    %cst_68 = arith.constant dense<0.000000e+00> : vector<4x512xf32>
    %164 = tpu.matmul %163, %162, %cst_68 {dimension_numbers = #tpu.dot_dimension_numbers<[1], [0], [0], [1], [0, 0, 1, 1], [], []>} : vector<4x4xf32>, vector<4x512xf32>, vector<4x512xf32> -> vector<4x512xf32>
    %165 = arith.addf %158, %164 : vector<4x512xf32>
    %c1_i32_69 = arith.constant 1 : i32
    %166 = tpu.dynamic_rotate %143 by %c1_i32_69 dim 1 : vector<4x512xf32>, i32 -> vector<4x512xf32>
    %c3 = arith.constant 3 : index
    %c0_70 = arith.constant 0 : index
    %167 = vector.load %arg2[%c3, %c0_70] : memref<64x512xf32, #tpu.memory_space<vmem>>, vector<1x512xf32>
    %168 = vector.broadcast %167 : vector<1x512xf32> to vector<4x512xf32>
    %169 = arith.mulf %166, %168 : vector<4x512xf32>
    %c112 = arith.constant 112 : index
    %c0_71 = arith.constant 0 : index
    %170 = vector.load %arg3[%c112, %c0_71] : memref<160x128xf32, #tpu.memory_space<vmem>>, vector<4x4xf32>
    %cst_72 = arith.constant dense<0.000000e+00> : vector<4x512xf32>
    %171 = tpu.matmul %170, %169, %cst_72 {dimension_numbers = #tpu.dot_dimension_numbers<[1], [0], [0], [1], [0, 0, 1, 1], [], []>} : vector<4x4xf32>, vector<4x512xf32>, vector<4x512xf32> -> vector<4x512xf32>
    %172 = arith.addf %165, %171 : vector<4x512xf32>
    %c120 = arith.constant 120 : index
    %c0_73 = arith.constant 0 : index
    %173 = vector.load %arg3[%c120, %c0_73] : memref<160x128xf32, #tpu.memory_space<vmem>>, vector<4x4xf32>
    %cst_74 = arith.constant dense<0.000000e+00> : vector<4x512xf32>
    %174 = tpu.matmul %173, %143, %cst_74 {dimension_numbers = #tpu.dot_dimension_numbers<[1], [0], [0], [1], [0, 0, 1, 1], [], []>} : vector<4x4xf32>, vector<4x512xf32>, vector<4x512xf32> -> vector<4x512xf32>
    %175 = arith.addf %172, %174 : vector<4x512xf32>
    %c511_i32_75 = arith.constant 511 : i32
    %176 = tpu.dynamic_rotate %143 by %c511_i32_75 dim 1 : vector<4x512xf32>, i32 -> vector<4x512xf32>
    %c5 = arith.constant 5 : index
    %c0_76 = arith.constant 0 : index
    %177 = vector.load %arg2[%c5, %c0_76] : memref<64x512xf32, #tpu.memory_space<vmem>>, vector<1x512xf32>
    %178 = vector.broadcast %177 : vector<1x512xf32> to vector<4x512xf32>
    %179 = arith.mulf %176, %178 : vector<4x512xf32>
    %c128 = arith.constant 128 : index
    %c0_77 = arith.constant 0 : index
    %180 = vector.load %arg3[%c128, %c0_77] : memref<160x128xf32, #tpu.memory_space<vmem>>, vector<4x4xf32>
    %cst_78 = arith.constant dense<0.000000e+00> : vector<4x512xf32>
    %181 = tpu.matmul %180, %179, %cst_78 {dimension_numbers = #tpu.dot_dimension_numbers<[1], [0], [0], [1], [0, 0, 1, 1], [], []>} : vector<4x4xf32>, vector<4x512xf32>, vector<4x512xf32> -> vector<4x512xf32>
    %182 = arith.addf %175, %181 : vector<4x512xf32>
    %c497_i32_79 = arith.constant 497 : i32
    %183 = tpu.dynamic_rotate %143 by %c497_i32_79 dim 1 : vector<4x512xf32>, i32 -> vector<4x512xf32>
    %c6 = arith.constant 6 : index
    %c0_80 = arith.constant 0 : index
    %184 = vector.load %arg2[%c6, %c0_80] : memref<64x512xf32, #tpu.memory_space<vmem>>, vector<1x512xf32>
    %185 = vector.broadcast %184 : vector<1x512xf32> to vector<4x512xf32>
    %186 = arith.mulf %183, %185 : vector<4x512xf32>
    %c136 = arith.constant 136 : index
    %c0_81 = arith.constant 0 : index
    %187 = vector.load %arg3[%c136, %c0_81] : memref<160x128xf32, #tpu.memory_space<vmem>>, vector<4x4xf32>
    %cst_82 = arith.constant dense<0.000000e+00> : vector<4x512xf32>
    %188 = tpu.matmul %187, %186, %cst_82 {dimension_numbers = #tpu.dot_dimension_numbers<[1], [0], [0], [1], [0, 0, 1, 1], [], []>} : vector<4x4xf32>, vector<4x512xf32>, vector<4x512xf32> -> vector<4x512xf32>
    %189 = arith.addf %182, %188 : vector<4x512xf32>
    %c496_i32_83 = arith.constant 496 : i32
    %190 = tpu.dynamic_rotate %143 by %c496_i32_83 dim 1 : vector<4x512xf32>, i32 -> vector<4x512xf32>
    %c7 = arith.constant 7 : index
    %c0_84 = arith.constant 0 : index
    %191 = vector.load %arg2[%c7, %c0_84] : memref<64x512xf32, #tpu.memory_space<vmem>>, vector<1x512xf32>
    %192 = vector.broadcast %191 : vector<1x512xf32> to vector<4x512xf32>
    %193 = arith.mulf %190, %192 : vector<4x512xf32>
    %c144 = arith.constant 144 : index
    %c0_85 = arith.constant 0 : index
    %194 = vector.load %arg3[%c144, %c0_85] : memref<160x128xf32, #tpu.memory_space<vmem>>, vector<4x4xf32>
    %cst_86 = arith.constant dense<0.000000e+00> : vector<4x512xf32>
    %195 = tpu.matmul %194, %193, %cst_86 {dimension_numbers = #tpu.dot_dimension_numbers<[1], [0], [0], [1], [0, 0, 1, 1], [], []>} : vector<4x4xf32>, vector<4x512xf32>, vector<4x512xf32> -> vector<4x512xf32>
    %196 = arith.addf %189, %195 : vector<4x512xf32>
    %c495_i32_87 = arith.constant 495 : i32
    %197 = tpu.dynamic_rotate %143 by %c495_i32_87 dim 1 : vector<4x512xf32>, i32 -> vector<4x512xf32>
    %c8 = arith.constant 8 : index
    %c0_88 = arith.constant 0 : index
    %198 = vector.load %arg2[%c8, %c0_88] : memref<64x512xf32, #tpu.memory_space<vmem>>, vector<1x512xf32>
    %199 = vector.broadcast %198 : vector<1x512xf32> to vector<4x512xf32>
    %200 = arith.mulf %197, %199 : vector<4x512xf32>
    %c152 = arith.constant 152 : index
    %c0_89 = arith.constant 0 : index
    %201 = vector.load %arg3[%c152, %c0_89] : memref<160x128xf32, #tpu.memory_space<vmem>>, vector<4x4xf32>
    %cst_90 = arith.constant dense<0.000000e+00> : vector<4x512xf32>
    %202 = tpu.matmul %201, %200, %cst_90 {dimension_numbers = #tpu.dot_dimension_numbers<[1], [0], [0], [1], [0, 0, 1, 1], [], []>} : vector<4x4xf32>, vector<4x512xf32>, vector<4x512xf32> -> vector<4x512xf32>
    %203 = arith.addf %196, %202 : vector<4x512xf32>
    %cst_91 = arith.constant 0.000000e+00 : f32
    %204 = vector.broadcast %cst_91 : f32 to vector<4x512xf32>
    %205 = arith.maximumf %203, %204 : vector<4x512xf32>
    %c72 = arith.constant 72 : index
    %c0_92 = arith.constant 0 : index
    %206 = vector.load %arg3[%c72, %c0_92] : memref<160x128xf32, #tpu.memory_space<vmem>>, vector<4x4xf32>
    %cst_93 = arith.constant dense<0.000000e+00> : vector<4x512xf32>
    %207 = tpu.matmul %206, %205, %cst_93 {dimension_numbers = #tpu.dot_dimension_numbers<[1], [0], [0], [1], [0, 0, 1, 1], [], []>} : vector<4x4xf32>, vector<4x512xf32>, vector<4x512xf32> -> vector<4x512xf32>
    %c80 = arith.constant 80 : index
    %c0_94 = arith.constant 0 : index
    %208 = vector.load %arg3[%c80, %c0_94] : memref<160x128xf32, #tpu.memory_space<vmem>>, vector<4x1xf32>
    %209 = vector.broadcast %208 : vector<4x1xf32> to vector<4x512xf32>
    %210 = arith.addf %207, %209 : vector<4x512xf32>
    %211 = arith.negf %210 : vector<4x512xf32>
    %212 = math.exp %211 : vector<4x512xf32>
    %cst_95 = arith.constant 1.000000e+00 : f32
    %213 = vector.broadcast %cst_95 : f32 to vector<4x512xf32>
    %214 = arith.addf %213, %212 : vector<4x512xf32>
    %215 = arith.divf %213, %214 : vector<4x512xf32>
    %216 = arith.mulf %0, %215 : vector<4x512xf32>
    %c0_96 = arith.constant 0 : index
    %c0_97 = arith.constant 0 : index
    %217 = vector.load %arg4[%c0_96, %c0_97] : memref<4x512xf32, #tpu.memory_space<vmem>>, vector<4x512xf32>
    tpu.vector_store %arg4[%c0_96, %c0_97], %216 {strides = array<i32>} : memref<4x512xf32, #tpu.memory_space<vmem>>, vector<4x512xf32>,
    return
  }
  func.func @transform_0(%arg0: i32) -> (i32, i32) {
    %c0_i32 = arith.constant 0 : i32
    %c0_i32_0 = arith.constant 0 : i32
    return %c0_i32, %arg0 : i32, i32
  }
  func.func @transform_1(%arg0: i32) -> (i32, i32) {
    %c0_i32 = arith.constant 0 : i32
    %c0_i32_0 = arith.constant 0 : i32
    %c0_i32_1 = arith.constant 0 : i32
    return %c0_i32, %c0_i32_0 : i32, i32
  }
  func.func @transform_2(%arg0: i32) -> (i32, i32) {
    %c0_i32 = arith.constant 0 : i32
    %c0_i32_0 = arith.constant 0 : i32
    %c0_i32_1 = arith.constant 0 : i32
    return %c0_i32, %c0_i32_0 : i32, i32
  }
  func.func @transform_3(%arg0: i32) -> (i32, i32) {
    %c0_i32 = arith.constant 0 : i32
    %c0_i32_0 = arith.constant 0 : i32
    return %c0_i32, %arg0 : i32, i32
  }
}

</mosaic_0001>

<bundles_post_ra>
// kernel: tpu_custom_call.1
= control target key start
LH: loop header
LB: loop body
LE: loop exit
PB: predicated region body
PF: predicated region fallthrough
CT: control target
= control target key end

     0   :  { %8 = vsyncpa [#allocation3], 0  ;;  %s3307_s0 = inlined_call_operand.hbm [shape: f32[4,512], index: 0, kind: input, shape index: {}]   ;;  %s3308_s1 = inlined_call_operand.hbm [shape: f32[64,512], index: 1, kind: input, shape index: {}]   ;;  %s3309_s2 = inlined_call_operand.hbm [shape: f32[160,128], index: 2, kind: input, shape index: {}]   ;;  %s3310_s3 = inlined_call_operand.hbm [shape: f32[4,512], index: 3, kind: output, shape index: {}]  }
   0x1   :  { %9 = vsyncpa [#allocation6], 0  ;;  %s26_s14 = sshll.u32 %s3308_s1, 4  ;;  %s27_s14 = int_to_ptr.hbm [resolvable:$true] %s26_s14 }
   0x2   :  { %10 = vsyncpa [#allocation4], 0  ;;  %s2669_s15 = smov [#allocation5]   ;;  %s16_s19 = sshll.u32 %s3307_s0, 4  ;;  %s17_s19 = int_to_ptr.hbm [resolvable:$true] %s16_s19 }
   0x3   :  { %s28_s16 = sshll.u32 %s2669_s15, 4  ;;  %s2670_s20 = smov 512   ;;  %s29_s16 = int_to_ptr.vmem [resolvable:$true] %s28_s16 }
   0x4   :  { %s2671_s21 = smov 32   ;;  %s2672_s22 = smov [#allocation2]  }
   0x5   :  { %34 = dma.hbm_to_vmem [thread:$0]  %s27_s14, 4096, %s29_s16, [#allocation6], %s2670_s20, %s2670_s20, %s2671_s21  }
   0x6   :  { %s18_s23 = sshll.u32 %s2672_s22, 4  ;;  %s39_s26 = sshll.u32 %s3309_s2, 4  ;;  %s19_s23 = int_to_ptr.vmem [resolvable:$true] %s18_s23  ;;  %s40_s26 = int_to_ptr.hbm [resolvable:$true] %s39_s26 }
   0x7   :  { %21 = dma.hbm_to_vmem [thread:$0]  %s17_s19, 256, %s19_s23, [#allocation3]  }
   0x8   :  { %s2673_s1 = smov [#allocation7]   ;;  %s2674_s28 = smov 128  }
   0x9   :  { %s41_s27 = sshll.u32 %s2673_s1, 4  ;;  %s2675_s29 = smov 8   ;;  %s42_s27 = int_to_ptr.vmem [resolvable:$true] %s41_s27 }
   0xa   :  { %47 = dma.hbm_to_vmem [thread:$0]  %s40_s26, 2560, %s42_s27, [#allocation6], %s2674_s28, %s2674_s28, %s2675_s29  }
   0xb   :  { %2663 = dma.done.wait [#allocation3], 256  }
   0xc   :  { %2664 = vsyncadd [#allocation3], 4294967040 }
   0xd   :  { %2665 = dma.done.wait [#allocation6], 6656  }
   0xe   :  { %2666 = vsyncadd [#allocation6], 4294960640  ;;  %v2676_v0 = vmov 0   ;;  %v2716_v1 = vld [vmem:[#allocation2] sm:$0xff]  ;;  %v2718_v2 = vld [vmem:[#allocation2 + $0x8] sm:$0xff]  ;;  %vm92_vm0 = vcmask 1043456  }
   0xf   :  { %2547 = vset.pattern.permute.xlu0 %v2676_v0  ;;  %2548 = vset.pattern.permute.xlu1 %v2676_v0  ;;  %78 = vst [vmem:[#allocation1] ss:$2 sm:$0xff] %v2716_v1  ;;  %v64_v3 = vld [vmem:[#allocation7 + $0x10] sm:$0xff]  ;;  %v62_v4 = vld [vmem:[#allocation7] sm:$0xff]  ;;  %vm85_vm1 = vcmask 31744   ;;  %v2677_v9 = vmov 4.0  }
  0x10   :  { %80 = vst [vmem:[#allocation1 + $0x10] ss:$2 sm:$0xff] %v2718_v2  ;;  %68 = vperm.xlu0 %2547, %v64_v3   ;;  %2549 = vrcp.f32 %v2677_v9  ;;  %v658_v10 = vld [vmem:[#allocation5 + $0xc1] ss:$8 sm:$0xf]  ;;  %vm622_vm2 = vcmask 1047556  }
  0x11   :  { %v683_v14 = vld [vmem:[#allocation5 + $0xe1] ss:$8 sm:$0xf]  ;;  %v660_v15 = vperm.slane %v658_v10, 0  ;;  %v661_v16 = vperm.slane %v658_v10, 1  ;;  %v662_v34 = vperm.slane %v658_v10, 2 }
  0x12   :  { %v685_v22 = vperm.slane %v683_v14, 0  ;;  %v686_v23 = vperm.slane %v683_v14, 1  ;;  %v687_v29 = vperm.slane %v683_v14, 2  ;;  %v688_v30 = vperm.slane %v683_v14, 3  ;;  %s2678_s0 = smov 17   ;;  %s2679_s2 = smov 16  }
  0x13   :  { %v608_v31 = vld [vmem:[#allocation5 + $0xc0] ss:$8 sm:$0xf]  ;;  %v663_v38 = vperm.slane %v658_v10, 3  ;;  %vm260_vm4 = vcmask 1040384   ;;  %s2680_s30 = smov 1  }
  0x14   :  { %v610_v39 = vperm.slane %v608_v31, 0  ;;  %v611_v40 = vperm.slane %v608_v31, 1  ;;  %v612_v44 = vperm.slane %v608_v31, 2  ;;  %v634_v45 = vld [vmem:[#allocation5 + $0xe0] ss:$8 sm:$0xf] }
  0x15   :  { %v613_v49 = vperm.slane %v608_v31, 3  ;;  %v636_v56 = vperm.slane %v634_v45, 0  ;;  %v637_v57 = vperm.slane %v634_v45, 1  ;;  %v638_v3 = vperm.slane %v634_v45, 2  ;;  %s2681_s4 = smov 15   ;;  %s2682_s5 = smov 113  }
  0x16   :  { %v81_v5 = vld.sshfl [vmem:[#allocation1] sm:$0xff pattern:$0x75316420]  ;;  %v82_v6 = vld.sshfl [vmem:[#allocation1 + $0x8] sm:$0xff pattern:$0x75316420]  ;;  %v2730_v17 = vpop.eup %2549 }
  0x17   :  { %2406 = vmatpush.msk.msra.mxu0 %vm92_vm0, %v81_v5  ;;  %2409 = vmatpush.msk.msra.mxu1 %vm92_vm0, %v82_v6  ;;  %v83_v7 = vld.sshfl [vmem:[#allocation1 + $0x10] sm:$0xff pattern:$0x75316420]  ;;  %v84_v8 = vld.sshfl [vmem:[#allocation1 + $0x18] sm:$0xff pattern:$0x75316420]  ;;  %vm226_vm3 = vweird.f32 %v2730_v17 }
  0x18   :  { %2412 = vmatpush.msk.msra.mxu2 %vm92_vm0, %v83_v7  ;;  %2415 = vmatpush.msk.msra.mxu3 %vm92_vm0, %v84_v8  ;;  %v2739_v26 = vmul.f32 4.0, %v2730_v17  ;;  %s2683_s6 = smov 127   ;;  %s2684_s7 = smov 112   ;;  %vm706_vm5 = vcmask 7168   ;;  %vm714_vm6 = vcmask 64512   ;;  %vm290_vm9 = vcmask 1042434  }
  0x19   :  { %2407 = vmatmul.msk.f32.vlgmr.msra.gmra.mxu0 %vm85_vm1, %v62_v4  ;;  %2410 = vmatmul.msk.f32.vlgmr.msra.gmra.mxu1 %vm85_vm1, %v62_v4  ;;  %s2685_s8 = smov 111   ;;  %vm292_vm10 = vcmask 1041408   ;;  %s2686_s9 = smov [#allocation8]  }
  0x1a   :  { %2413 = vmatmul.msk.f32.vlgmr.msra.gmra.mxu2 %vm85_vm1, %v62_v4  ;;  %2416 = vmatmul.msk.f32.vlgmr.msra.gmra.mxu3 %vm85_vm1, %v62_v4  ;;  %v223_v37 = vsub.f32 1.0, %v2739_v26  ;;  %s2393_s10 = sshll.u32 %s2686_s9, 4  ;;  %s2395_s13 = sshll.u32 %s3310_s3, 4  ;;  %s2394_s10 = int_to_ptr.vmem [resolvable:$true] %s2393_s10  ;;  %s2396_s13 = int_to_ptr.hbm [resolvable:$true] %s2395_s13 }
  0x82   :  { %v69_v11 = vpop.permute.xlu0 %68 }
  0x96   :  { %v118_v12 = vpop.f32.mrf.mxu0  ;;  %v141_v13 = vpop.f32.mrf.mxu1 }
  0x97   :  { %v2732_v18 = vadd.f32 %v118_v12, %v69_v11  ;;  %v2734_v19 = vadd.f32 %v141_v13, %v69_v11 }
  0x99   :  { %v668_v24 = vmul.f32 %v660_v15, %v2732_v18  ;;  %v669_v25 = vmul.f32 %v661_v16, %v2734_v19  ;;  %v693_v32 = vadd.f32 %v685_v22, %v2732_v18  ;;  %v694_v33 = vadd.f32 %v686_v23, %v2734_v19 }
  0x9a   :  { %v193_v41 = vsel %vm92_vm0, %v2732_v18, 0.0  ;;  %v618_v61 = vmul.f32 %v610_v39, %v2732_v18  ;;  %v232_v62 = vsel %vm92_vm0, %v2732_v18, -inf  ;;  %v200_v63 = vsel %vm92_vm0, %v2734_v19, 0.0 }
  0x9b   :  { %v672_v35 = vsel %vm622_vm2, %v668_v24, 0.0  ;;  %v673_v36 = vsel %vm622_vm2, %v669_v25, 0.0  ;;  %v697_v46 = vsel %vm622_vm2, %v693_v32, -inf  ;;  %v698_v47 = vsel %vm622_vm2, %v694_v33, -inf }
  0x9c   :  { %v674_v48 = vadd.f32 %v673_v36, %v672_v35  ;;  %v194_v54 = vrot.slane %v193_v41, 4  ;;  %v701_v58 = vmax.f32 %v697_v46, %v698_v47  ;;  %v619_v6 = vmul.f32 %v611_v40, %v2734_v19 }
  0x9d   :  { %v164_v20 = vpop.f32.mrf.mxu2  ;;  %v187_v21 = vpop.f32.mrf.mxu3  ;;  %v623_v14 = vsel %vm622_vm2, %v618_v61, 0.0  ;;  %v233_v16 = vrot.slane %v232_v62, 4  ;;  %v644_v24 = vadd.f32 %v636_v56, %v2732_v18  ;;  %v645_v25 = vadd.f32 %v637_v57, %v2734_v19 }
  0x9e   :  { %v2741_v27 = vadd.f32 %v164_v20, %v69_v11  ;;  %v2743_v28 = vadd.f32 %v187_v21, %v69_v11  ;;  %v195_v8 = vadd.f32 %v194_v54, %v193_v41  ;;  %v639_v11 = vperm.slane %v634_v45, 3 }
  0x9f   :  { %v624_v15 = vsel %vm622_vm2, %v619_v6, 0.0  ;;  %v201_v20 = vrot.slane %v200_v63, 4  ;;  %v648_v35 = vsel %vm622_vm2, %v644_v24, -inf  ;;  %v649_v36 = vsel %vm622_vm2, %v645_v25, -inf }
  0xa0   :  { %v695_v42 = vadd.f32 %v687_v29, %v2741_v27  ;;  %v696_v43 = vadd.f32 %v688_v30, %v2743_v28  ;;  %v214_v50 = vsel %vm92_vm0, %v2743_v28, 0.0  ;;  %v670_v53 = vmul.f32 %v662_v34, %v2741_v27 }
  0xa1   :  { %v671_v55 = vmul.f32 %v663_v38, %v2743_v28  ;;  %v215_v0 = vrot.slane %v214_v50, 4  ;;  %v620_v7 = vmul.f32 %v612_v44, %v2741_v27  ;;  %v253_v9 = vsel %vm92_vm0, %v2743_v28, -inf }
  0xa2   :  { %v699_v51 = vsel %vm622_vm2, %v695_v42, -inf  ;;  %v700_v52 = vsel %vm622_vm2, %v696_v43, -inf  ;;  %v675_v60 = vsel %vm622_vm2, %v670_v53, 0.0  ;;  %v621_v13 = vmul.f32 %v613_v49, %v2743_v28 }
  0xa3   :  { %v702_v59 = vmax.f32 %v699_v51, %v700_v52  ;;  %v676_v5 = vadd.f32 %v675_v60, %v674_v48  ;;  %v677_v10 = vsel %vm622_vm2, %v671_v55, 0.0  ;;  %v625_v21 = vadd.f32 %v624_v15, %v623_v14 }
  0xa4   :  { %v626_v22 = vsel %vm622_vm2, %v620_v7, 0.0  ;;  %v216_v23 = vadd.f32 %v215_v0, %v214_v50  ;;  %v646_v29 = vadd.f32 %v638_v3, %v2741_v27  ;;  %v196_v30 = vrot.slane %v195_v8, 2 }
  0xa5   :  { %v703_v4 = vmax.f32 %v701_v58, %v702_v59  ;;  %v678_v12 = vadd.f32 %v677_v10, %v676_v5  ;;  %v254_v31 = vrot.slane %v253_v9, 4  ;;  %v627_v32 = vadd.f32 %v626_v22, %v625_v21 }
  0xa6   :  { %v647_v33 = vadd.f32 %v639_v11, %v2743_v28  ;;  %v628_v34 = vsel %vm622_vm2, %v621_v13, 0.0  ;;  %v650_v38 = vsel %vm622_vm2, %v646_v29, -inf  ;;  %v234_v39 = vmax.f32 %v232_v62, %v233_v16 }
  0xa7   :  { %704 = vmax.xlane.f32.xlu2 %v703_v4  ;;  %679 = vadd.xlane.f32.xlu1 %v678_v12  ;;  %v629_v40 = vadd.f32 %v628_v34, %v627_v32  ;;  %v239_v41 = vsel %vm92_vm0, %v2734_v19, -inf  ;;  %v217_v42 = vrot.slane %v216_v23, 2  ;;  %v652_v43 = vmax.f32 %v648_v35, %v649_v36  ;;  %v1071_v35 = vld [vmem:[#allocation7 + $0x40] sm:$0xf]  ;;  %v63_v36 = vld [vmem:[#allocation7 + $0x8] sm:$0xf] }
  0xa8   :  { %v651_v18 = vsel %vm622_vm2, %v647_v33, -inf  ;;  %v197_v45 = vadd.f32 %v196_v30, %v195_v8  ;;  %v202_v28 = vadd.f32 %v201_v20, %v200_v63  ;;  %v224_v46 = vmul.f32 %v2730_v17, %v223_v37  ;;  %2408 = vmatmul.msk.f32.gmra.mxu0 %vm85_vm1, %v63_v36  ;;  %2411 = vmatmul.msk.f32.gmra.mxu1 %vm85_vm1, %v63_v36 }
  0xa9   :  { %v653_v44 = vmax.f32 %v650_v38, %v651_v18  ;;  %630 = vadd.xlane.f32.xlu0 %v629_v40  ;;  %v255_v47 = vmax.f32 %v253_v9, %v254_v31  ;;  %v235_v49 = vrot.slane %v234_v39, 2  ;;  %v240_v50 = vrot.slane %v239_v41, 4  ;;  %2414 = vmatmul.msk.f32.gmra.mxu2 %vm85_vm1, %v63_v36  ;;  %v65_v40 = vld [vmem:[#allocation7 + $0x18] sm:$0xf] }
  0xaa   :  { %v218_v51 = vadd.f32 %v217_v42, %v216_v23  ;;  %v198_v52 = vrot.slane %v197_v45, 1  ;;  %v203_v53 = vrot.slane %v202_v28, 2  ;;  %v225_v19 = vadd.f32 %v2730_v17, %v224_v46  ;;  %2417 = vmatmul.msk.f32.gmra.mxu3 %vm85_vm1, %v63_v36 }
  0xab   :  { %v654_v48 = vmax.f32 %v652_v43, %v653_v44  ;;  %v256_v54 = vrot.slane %v255_v47, 2  ;;  %v236_v55 = vmax.f32 %v234_v39, %v235_v49  ;;  %v241_v56 = vmax.f32 %v239_v41, %v240_v50 }
  0xac   :  { %v219_v57 = vrot.slane %v218_v51, 1  ;;  %v199_v58 = vadd.f32 %v198_v52, %v197_v45  ;;  %v204_v26 = vadd.f32 %v203_v53, %v202_v28  ;;  %v227_v37 = vsel %vm226_vm3, %v2730_v17, %v225_v19 }
  0xad   :  { %v207_v59 = vsel %vm92_vm0, %v2741_v27, 0.0  ;;  %v257_v60 = vmax.f32 %v255_v47, %v256_v54  ;;  %v237_v61 = vrot.slane %v236_v55, 1  ;;  %v242_v62 = vrot.slane %v241_v56, 2  ;;  %v713_v47 = vld [vmem:[#allocation7 + $0x20] sm:$0x3] }
  0xae   :  { %v220_v63 = vadd.f32 %v219_v57, %v218_v51  ;;  %v228_v0 = vmul.f32 %v227_v37, %v199_v58  ;;  %v205_v3 = vrot.slane %v204_v26, 1  ;;  %v208_v4 = vrot.slane %v207_v59, 4 }
  0xaf   :  { %655 = vmax.xlane.f32.xlu1 %v654_v48  ;;  %v258_v5 = vrot.slane %v257_v60, 1  ;;  %v238_v6 = vmax.f32 %v236_v55, %v237_v61  ;;  %v243_v7 = vmax.f32 %v241_v56, %v242_v62  ;;  %v246_v8 = vsel %vm92_vm0, %v2741_v27, -inf }
  0xb0   :  { %v231_v9 = vmul.f32 %v227_v37, %v220_v63  ;;  %v206_v10 = vadd.f32 %v205_v3, %v204_v26  ;;  %v209_v17 = vadd.f32 %v208_v4, %v207_v59  ;;  %v247_v14 = vrot.slane %v246_v8, 4 }
  0xb1   :  { %v2799_v11 = vsel %vm260_vm4, %v228_v0, %v238_v6  ;;  %v259_v12 = vmax.f32 %v257_v60, %v258_v5  ;;  %v244_v13 = vrot.slane %v243_v7, 1  ;;  %v273_v51 = vlaneseq }
  0xb2   :  { %v229_v16 = vmul.f32 %v227_v37, %v206_v10  ;;  %v210_v20 = vrot.slane %v209_v17, 2  ;;  %v248_v21 = vmax.f32 %v246_v8, %v247_v14  ;;  %vm740_vm3 = vcmask 15360  }
  0xb3   :  { %v2804_v15 = vsel %vm260_vm4, %v231_v9, %v259_v12  ;;  %v245_v27 = vmax.f32 %v243_v7, %v244_v13  ;;  %v2881_v53 = vand.u32 127, %v273_v51 }
  0xb4   :  { %v211_v22 = vadd.f32 %v210_v20, %v209_v17  ;;  %v249_v24 = vrot.slane %v248_v21, 2 }
  0xb5   :  { %v2809_v23 = vsel %vm260_vm4, %v229_v16, %v245_v27  ;;  %vm275_vm7 = vcmp.lt.s32.totalorder %v2881_v53, 17  ;;  %vm316_vm8 = vcmp.lt.s32.totalorder %v2881_v53, 16  ;;  %vm394_vm11 = vcmp.lt.s32.totalorder %v2881_v53, 1  ;;  %v298_v27 = vld [vmem:[#allocation5 + $0x80] ss:$8 sm:$0xf] }
  0xb6   :  { %v212_v25 = vrot.slane %v211_v22, 1  ;;  %v250_v29 = vmax.f32 %v248_v21, %v249_v24  ;;  %vm355_vm12 = vcmp.lt.s32.totalorder %v2881_v53, 15  ;;  %vm459_vm13 = vcmp.lt.s32.totalorder %v2881_v53, 127 }
  0xb7   :  { %vm498_vm14 = vcmp.lt.s32.totalorder %v2881_v53, 113  ;;  %vm537_vm15 = vcmp.lt.s32.totalorder %v2881_v53, 112  ;;  %vm576_vm2 = vcmp.lt.s32.totalorder %v2881_v53, 111 }
  0xb8   :  { %v213_v30 = vadd.f32 %v212_v25, %v211_v22  ;;  %v251_v31 = vrot.slane %v250_v29, 1  ;;  %v281_v22 = vld [vmem:[#allocation5 + $0x40] ss:$8 sm:$0xf] }
  0xba   :  { %v230_v32 = vmul.f32 %v227_v37, %v213_v30  ;;  %v252_v33 = vmax.f32 %v250_v29, %v251_v31 }
  0xbc   :  { %v2824_v34 = vsel %vm260_vm4, %v230_v32, %v252_v33  ;;  %v322_v32 = vld [vmem:[#allocation5 + $0x41] ss:$8 sm:$0xf] }
  0xbd   :  { %314 = vrot.lane.b32.xlu0 %v2804_v15, %s2679_s2 }
  0xbf   :  { %265 = vrot.lane.b32.xlu2 %v2799_v11, %s2678_s0 }
  0xc5   :  { %386 = vrot.lane.b32.xlu0 %v2799_v11, %s2680_s30 }
  0xc7   :  { %310 = vrot.lane.b32.xlu2 %v2809_v23, %s2679_s2 }
  0xc8   :  { %267 = vrot.lane.b32.xlu1 %v2809_v23, %s2678_s0 }
  0xcd   :  { %392 = vrot.lane.b32.xlu0 %v2804_v15, %s2680_s30 }
  0xcf   :  { %347 = vrot.lane.b32.xlu2 %v2799_v11, %s2681_s4 }
  0xd0   :  { %308 = vrot.lane.b32.xlu1 %v2799_v11, %s2679_s2 }
  0xd5   :  { %492 = vrot.lane.b32.xlu0 %v2809_v23, %s2682_s5 }
  0xd7   :  { %269 = vrot.lane.b32.xlu2 %v2824_v34, %s2678_s0 }
  0xd8   :  { %349 = vrot.lane.b32.xlu1 %v2809_v23, %s2681_s4 }
  0xdd   :  { %455 = vrot.lane.b32.xlu0 %v2824_v34, %s2683_s6 }
  0xdf   :  { %271 = vrot.lane.b32.xlu2 %v2804_v15, %s2678_s0 }
  0xe0   :  { %312 = vrot.lane.b32.xlu1 %v2824_v34, %s2679_s2 }
  0xe5   :  { %529 = vrot.lane.b32.xlu0 %v2799_v11, %s2684_s7 }
  0xe7   :  { %388 = vrot.lane.b32.xlu2 %v2809_v23, %s2680_s30 }
  0xe8   :  { %353 = vrot.lane.b32.xlu1 %v2804_v15, %s2681_s4 }
  0xed   :  { %535 = vrot.lane.b32.xlu0 %v2804_v15, %s2684_s7 }
  0xef   :  { %351 = vrot.lane.b32.xlu2 %v2824_v34, %s2681_s4 }
  0xf0   :  { %390 = vrot.lane.b32.xlu1 %v2824_v34, %s2680_s30 }
  0xf5   :  { %572 = vrot.lane.b32.xlu0 %v2824_v34, %s2685_s8 }
  0xf7   :  { %451 = vrot.lane.b32.xlu2 %v2799_v11, %s2683_s6 }
  0xf8   :  { %453 = vrot.lane.b32.xlu1 %v2809_v23, %s2683_s6 }
  0xfd   :  { %1074 = vperm.xlu0 %2547, %v1071_v35  }
  0xff   :  { %531 = vrot.lane.b32.xlu2 %v2809_v23, %s2684_s7 }
 0x100   :  { %490 = vrot.lane.b32.xlu1 %v2799_v11, %s2682_s5 }
 0x107   :  { %457 = vrot.lane.b32.xlu2 %v2804_v15, %s2683_s6 }
 0x108   :  { %496 = vrot.lane.b32.xlu1 %v2804_v15, %s2682_s5 }
 0x10f   :  { %494 = vrot.lane.b32.xlu2 %v2824_v34, %s2682_s5 }
 0x110   :  { %533 = vrot.lane.b32.xlu1 %v2824_v34, %s2684_s7 }
 0x117   :  { %568 = vrot.lane.b32.xlu2 %v2799_v11, %s2685_s8 }
 0x118   :  { %570 = vrot.lane.b32.xlu1 %v2809_v23, %s2685_s8 }
 0x11a   :  { %v705_v38 = vpop.xlane.xlu2 %704  ;;  %v680_v39 = vpop.xlane.xlu1 %679 }
 0x11b   :  { %v681_v18 = vmul.f32 0.00390625, %v680_v39 }
 0x11c   :  { %v631_v41 = vpop.xlane.xlu0 %630 }
 0x11d   :  { %v632_v42 = vmul.f32 0.00390625, %v631_v41 }
 0x11f   :  { %574 = vrot.lane.b32.xlu2 %v2804_v15, %s2685_s8  ;;  %v707_v45 = vsel %vm706_vm5, %v632_v42, %v681_v18 }
 0x120   :  { %73 = vperm.xlu1 %2548, %v65_v40   ;;  %v710_v46 = vrot.slane %v707_v45, 4  ;;  %v337_v45 = vld [vmem:[#allocation5 + $0x81] ss:$8 sm:$0xf] }
 0x122   :  { %v266_v43 = vpop.permute.xlu2 %265  ;;  %v656_v44 = vpop.xlane.xlu1 %655 }
 0x123   :  { %v708_v28 = vsel %vm706_vm5, %v656_v44, %v705_v38 }
 0x124   :  { %v712_v48 = vsel %vm92_vm0, %v710_v46, %v708_v28 }
 0x125   :  { %733 = vmatpush.msrb.mxu0 %v712_v48 }
 0x126   :  { %2418 = vmatmul.msk.f32.vlgmr.msrb.gmra.mxu0 %vm714_vm6, %v713_v47 }
 0x12a   :  { %v311_v49 = vpop.permute.xlu2 %310 }
 0x12f   :  { %v315_v52 = vpop.permute.xlu0 %314 }
 0x132   :  { %v2879_v50 = vpop.permute.xlu2 %347 }
 0x137   :  { %v387_v57 = vpop.permute.xlu0 %386 }
 0x13a   :  { %v270_v19 = vpop.permute.xlu2 %269  ;;  %v268_v54 = vpop.permute.xlu1 %267 }
 0x13b   :  { %v278_v55 = vsel %vm275_vm7, %v266_v43, %v268_v54  ;;  %v277_v56 = vsel %vm275_vm7, %v268_v54, %v270_v19 }
 0x13c   :  { %300 = vst [vmem:[#allocation1 + $0x9] sm:$0xff] %v278_v55  ;;  %v286_v58 = vrot.slane %v278_v55, 7  ;;  %v287_v60 = vrot.slane %v277_v56, 6 }
 0x13d   :  { %301 = vst [vmem:[#allocation1 + $0x12] sm:$0xff] %v277_v56 }
 0x13f   :  { %v393_v8 = vpop.permute.xlu0 %392 }
 0x140   :  { %v398_v14 = vsel %vm394_vm11, %v393_v8, %v387_v57 }
 0x142   :  { %v272_v26 = vpop.permute.xlu2 %271  ;;  %v309_v61 = vpop.permute.xlu1 %308 }
 0x143   :  { %v276_v37 = vsel %vm275_vm7, %v270_v19, %v272_v26  ;;  %v279_v59 = vsel %vm275_vm7, %v272_v26, %v266_v43  ;;  %v319_v0 = vsel %vm316_vm8, %v309_v61, %v311_v49  ;;  %v320_v5 = vsel %vm316_vm8, %v315_v52, %v309_v61  ;;  %v361_v19 = vld [vmem:[#allocation5 + $0x42] ss:$8 sm:$0xf] }
 0x144   :  { %v288_v62 = vrot.slane %v276_v37, 5  ;;  %v289_v63 = vsel %vm260_vm4, %v279_v59, %v286_v58  ;;  %299 = vst [vmem:[#allocation1] sm:$0xff] %v279_v59  ;;  %v327_v3 = vrot.slane %v319_v0, 7 }
 0x145   :  { %302 = vst [vmem:[#allocation1 + $0x1b] sm:$0xff] %v276_v37 }
 0x146   :  { %v291_v4 = vsel %vm290_vm9, %v287_v60, %v288_v62  ;;  %v330_v7 = vsel %vm260_vm4, %v320_v5, %v327_v3  ;;  %v400_v3 = vld [vmem:[#allocation5 + $0x43] ss:$8 sm:$0xf] }
 0x147   :  { %v293_v6 = vsel %vm292_vm10, %v289_v63, %v291_v4  ;;  %v2920_v40 = vpop.permute.xlu0 %492 }
 0x148   :  { %v295_v33 = vmul.f32 %v293_v6, %v281_v22 }
 0x14a   :  { %v389_v9 = vpop.permute.xlu2 %388  ;;  %v350_v12 = vpop.permute.xlu1 %349 }
 0x14b   :  { %v2904_v10 = vsel %vm394_vm11, %v387_v57, %v389_v9  ;;  %v358_v36 = vsel %vm355_vm12, %v2879_v50, %v350_v12 }
 0x14c   :  { %v304_v17 = vld [vmem:[#allocation1 + $0x1] ss:$9 sm:$0xff]  ;;  %v405_v13 = vrot.slane %v2904_v10, 7  ;;  %v366_v43 = vrot.slane %v358_v36, 7 }
 0x14d   :  { %338 = vst [vmem:[#allocation1] sm:$0xff] %v320_v5  ;;  %v306_v29 = vmul.f32 %v304_v17, %v298_v27 }
 0x14e   :  { %339 = vst [vmem:[#allocation1 + $0x9] sm:$0xff] %v319_v0  ;;  %v408_v16 = vsel %vm260_vm4, %v398_v14, %v405_v13  ;;  %v376_v0 = vld [vmem:[#allocation5 + $0x82] ss:$8 sm:$0xf] }
 0x14f   :  { %v307_v39 = vadd.f32 %v306_v29, %v295_v33 }
 0x152   :  { %v352_v20 = vpop.permute.xlu2 %351  ;;  %v313_v21 = vpop.permute.xlu1 %312 }
 0x153   :  { %v317_v24 = vsel %vm316_vm8, %v313_v21, %v315_v52  ;;  %v318_v25 = vsel %vm316_vm8, %v311_v49, %v313_v21  ;;  %v357_v42 = vsel %vm355_vm12, %v350_v12, %v352_v20 }
 0x154   :  { %v328_v30 = vrot.slane %v318_v25, 6  ;;  %v329_v31 = vrot.slane %v317_v24, 5  ;;  %340 = vst [vmem:[#allocation1 + $0x12] sm:$0xff] %v318_v25  ;;  %v367_v49 = vrot.slane %v357_v42, 6 }
 0x155   :  { %341 = vst [vmem:[#allocation1 + $0x1b] sm:$0xff] %v317_v24 }
 0x156   :  { %v331_v35 = vsel %vm290_vm9, %v328_v30, %v329_v31  ;;  %v415_v31 = vld [vmem:[#allocation5 + $0x83] ss:$8 sm:$0xf] }
 0x157   :  { %v332_v38 = vsel %vm292_vm10, %v330_v7, %v331_v35 }
 0x158   :  { %v334_v18 = vmul.f32 %v332_v38, %v322_v32  ;;  %v433_v38 = vrot.slane %v2804_v15, 5 }
 0x15a   :  { %v452_v41 = vpop.permute.xlu2 %451  ;;  %v335_v44 = vadd.f32 %v334_v18, %v307_v39  ;;  %v354_v28 = vpop.permute.xlu1 %353 }
 0x15b   :  { %v356_v46 = vsel %vm355_vm12, %v352_v20, %v354_v28  ;;  %v359_v47 = vsel %vm355_vm12, %v354_v28, %v2879_v50  ;;  %v456_v50 = vpop.permute.xlu0 %455 }
 0x15c   :  { %v343_v48 = vld [vmem:[#allocation1 + $0x1] ss:$9 sm:$0xff]  ;;  %v368_v51 = vrot.slane %v356_v46, 5  ;;  %v369_v52 = vsel %vm260_vm4, %v359_v47, %v366_v43  ;;  %v431_v43 = vrot.slane %v2809_v23, 7 }
 0x15d   :  { %378 = vst [vmem:[#allocation1 + $0x9] sm:$0xff] %v358_v36  ;;  %v345_v54 = vmul.f32 %v343_v48, %v337_v45  ;;  %v432_v36 = vrot.slane %v2824_v34, 6  ;;  %v426_v48 = vld [vmem:[#allocation5 + $0x44] ss:$8 sm:$0xf] }
 0x15e   :  { %379 = vst [vmem:[#allocation1 + $0x12] sm:$0xff] %v357_v42  ;;  %v370_v55 = vsel %vm290_vm9, %v367_v49, %v368_v51  ;;  %v441_v49 = vld [vmem:[#allocation5 + $0x84] ss:$8 sm:$0xf] }
 0x15f   :  { %v371_v56 = vsel %vm292_vm10, %v369_v52, %v370_v55  ;;  %377 = vst [vmem:[#allocation1] sm:$0xff] %v359_v47  ;;  %v346_v57 = vadd.f32 %v345_v54, %v335_v44 }
 0x160   :  { %v373_v58 = vmul.f32 %v371_v56, %v361_v19  ;;  %380 = vst [vmem:[#allocation1 + $0x1b] sm:$0xff] %v356_v46  ;;  %v435_v46 = vsel %vm290_vm9, %v432_v36, %v433_v38  ;;  %v465_v56 = vld [vmem:[#allocation5 + $0x45] ss:$8 sm:$0xf] }
 0x162   :  { %v2932_v26 = vpop.permute.xlu2 %531  ;;  %v374_v37 = vadd.f32 %v373_v58, %v346_v57  ;;  %v391_v59 = vpop.permute.xlu1 %390 }
 0x163   :  { %v395_v60 = vsel %vm394_vm11, %v391_v59, %v393_v8  ;;  %v396_v61 = vsel %vm394_vm11, %v389_v9, %v391_v59 }
 0x164   :  { %v406_v62 = vrot.slane %v396_v61, 6  ;;  %v407_v63 = vrot.slane %v395_v60, 5 }
 0x166   :  { %v409_v4 = vsel %vm290_vm9, %v406_v62, %v407_v63 }
 0x167   :  { %v382_v5 = vld [vmem:[#allocation1 + $0x1] ss:$9 sm:$0xff]  ;;  %v410_v6 = vsel %vm292_vm10, %v408_v16, %v409_v4  ;;  %v2951_v16 = vpop.permute.xlu0 %529 }
 0x168   :  { %v384_v7 = vmul.f32 %v382_v5, %v376_v0  ;;  %416 = vst [vmem:[#allocation1] sm:$0xff] %v398_v14  ;;  %v412_v17 = vmul.f32 %v410_v6, %v400_v3 }
 0x169   :  { %417 = vst [vmem:[#allocation1 + $0x9] sm:$0xff] %v2904_v10 }
 0x16a   :  { %v458_v12 = vpop.permute.xlu2 %457  ;;  %v385_v13 = vadd.f32 %v384_v7, %v374_v37  ;;  %418 = vst [vmem:[#allocation1 + $0x12] sm:$0xff] %v396_v61  ;;  %v454_v20 = vpop.permute.xlu1 %453 }
 0x16b   :  { %v460_v8 = vsel %vm459_vm13, %v456_v50, %v458_v12  ;;  %v2946_v9 = vsel %vm459_vm13, %v458_v12, %v452_v41  ;;  %419 = vst [vmem:[#allocation1 + $0x1b] sm:$0xff] %v395_v60  ;;  %v461_v14 = vsel %vm459_vm13, %v454_v20, %v456_v50  ;;  %v462_v25 = vsel %vm459_vm13, %v452_v41, %v454_v20 }
 0x16c   :  { %v471_v27 = vrot.slane %v460_v8, 6  ;;  %v472_v21 = vrot.slane %v2946_v9, 5  ;;  %v413_v10 = vadd.f32 %v412_v17, %v385_v13  ;;  %v470_v22 = vrot.slane %v461_v14, 7 }
 0x16d   :  { %v540_v20 = vsel %vm537_vm15, %v2951_v16, %v2932_v26 }
 0x16e   :  { %v474_v24 = vsel %vm290_vm9, %v471_v27, %v472_v21  ;;  %v473_v29 = vsel %vm260_vm4, %v462_v25, %v470_v22  ;;  %v480_v27 = vld [vmem:[#allocation5 + $0x85] ss:$8 sm:$0xf]  ;;  %v504_v21 = vld [vmem:[#allocation5 + $0x46] ss:$8 sm:$0xf] }
 0x16f   :  { %v475_v30 = vsel %vm292_vm10, %v473_v29, %v474_v24  ;;  %v536_v28 = vpop.permute.xlu0 %535 }
 0x170   :  { %v477_v60 = vmul.f32 %v475_v30, %v465_v56  ;;  %v541_v62 = vsel %vm537_vm15, %v536_v28, %v2951_v16  ;;  %v144_v56 = vpop.f32.mrf.mxu1 }
 0x171   :  { %v550_v12 = vrot.slane %v541_v62, 5 }
 0x172   :  { %v495_v32 = vpop.permute.xlu2 %494  ;;  %v421_v35 = vld [vmem:[#allocation1 + $0x1] ss:$9 sm:$0xff]  ;;  %v491_v39 = vpop.permute.xlu1 %490 }
 0x173   :  { %v2962_v33 = vsel %vm498_vm14, %v2920_v40, %v495_v32  ;;  %v423_v41 = vmul.f32 %v421_v35, %v415_v31  ;;  %444 = vst [vmem:[#allocation1 + $0x12] sm:$0xff] %v2824_v34  ;;  %v501_v42 = vsel %vm498_vm14, %v491_v39, %v2920_v40  ;;  %v434_v34 = vsel %vm260_vm4, %v2799_v11, %v431_v43 }
 0x174   :  { %v509_v18 = vrot.slane %v2962_v33, 7  ;;  %445 = vst [vmem:[#allocation1 + $0x1b] sm:$0xff] %v2804_v15  ;;  %v436_v40 = vsel %vm292_vm10, %v434_v34, %v435_v46  ;;  %v582_v46 = vld [vmem:[#allocation5 + $0x60] ss:$8 sm:$0xf] }
 0x175   :  { %v424_v45 = vadd.f32 %v423_v41, %v413_v10  ;;  %442 = vst [vmem:[#allocation1] sm:$0xff] %v2799_v11  ;;  %v438_v19 = vmul.f32 %v436_v40, %v426_v48 }
 0x176   :  { %v512_v44 = vsel %vm260_vm4, %v501_v42, %v509_v18  ;;  %443 = vst [vmem:[#allocation1 + $0x9] sm:$0xff] %v2809_v23  ;;  %v543_v18 = vld [vmem:[#allocation5 + $0x47] ss:$8 sm:$0xf] }
 0x177   :  { %v439_v57 = vadd.f32 %v438_v19, %v424_v45  ;;  %v573_v37 = vpop.permute.xlu0 %572  ;;  %v121_v45 = vpop.f32.mrf.mxu0  ;;  %v767_v19 = vld [vmem:[#allocation5 + $0xc0] sm:$0x3] }
 0x178   :  { %2421 = vmatpush.msk.msrb.mxu2 %vm292_vm10, %v767_v19 }
 0x17a   :  { %v569_v47 = vpop.permute.xlu2 %568  ;;  %v497_v15 = vpop.permute.xlu1 %496 }
 0x17b   :  { %v499_v51 = vsel %vm498_vm14, %v495_v32, %v497_v15  ;;  %v502_v52 = vsel %vm498_vm14, %v497_v15, %v491_v39  ;;  %v519_v39 = vld [vmem:[#allocation5 + $0x86] ss:$8 sm:$0xf] }
 0x17c   :  { %v510_v54 = vrot.slane %v499_v51, 6  ;;  %v511_v23 = vrot.slane %v502_v52, 5 }
 0x17d   :  { %v447_v55 = vld [vmem:[#allocation1 + $0x1] ss:$9 sm:$0xff] }
 0x17e   :  { %481 = vst [vmem:[#allocation1] sm:$0xff] %v462_v25  ;;  %v449_v11 = vmul.f32 %v447_v55, %v441_v49  ;;  %v513_v58 = vsel %vm290_vm9, %v510_v54, %v511_v23  ;;  %v768_v54 = vld [vmem:[#allocation5 + $0xc8] sm:$0x3]  ;;  %v769_v23 = vld [vmem:[#allocation5 + $0xd0] sm:$0x3] }
 0x17f   :  { %482 = vst [vmem:[#allocation1 + $0x9] sm:$0xff] %v461_v14  ;;  %v514_v50 = vsel %vm292_vm10, %v512_v44, %v513_v58  ;;  %2423 = vmatpush.msk.msrb.mxu3 %vm292_vm10, %v768_v54  ;;  %v770_v55 = vld [vmem:[#allocation5 + $0xd8] sm:$0x3]  ;;  %2425 = vmatpush.msk.msra.mxu0 %vm292_vm10, %v769_v23 }
 0x180   :  { %v450_v59 = vadd.f32 %v449_v11, %v439_v57  ;;  %483 = vst [vmem:[#allocation1 + $0x12] sm:$0xff] %v460_v8  ;;  %v516_v29 = vmul.f32 %v514_v50, %v504_v21  ;;  %v597_v57 = vld [vmem:[#allocation5 + $0xa0] ss:$8 sm:$0xf] }
 0x181   :  { %484 = vst [vmem:[#allocation1 + $0x1b] sm:$0xff] %v2946_v9 }
 0x182   :  { %v575_v61 = vpop.permute.xlu2 %574  ;;  %v478_v3 = vadd.f32 %v477_v60, %v450_v59  ;;  %v534_v4 = vpop.permute.xlu1 %533 }
 0x183   :  { %v577_v63 = vsel %vm576_vm2, %v573_v37, %v575_v61  ;;  %v580_v0 = vsel %vm576_vm2, %v575_v61, %v569_v47  ;;  %v538_v7 = vsel %vm537_vm15, %v534_v4, %v536_v28  ;;  %v539_v17 = vsel %vm537_vm15, %v2932_v26, %v534_v4  ;;  %v558_v28 = vld [vmem:[#allocation5 + $0x87] ss:$8 sm:$0xf]  ;;  %v190_v59 = vpop.f32.mrf.mxu3 }
 0x184   :  { %v588_v5 = vrot.slane %v577_v63, 6  ;;  %v589_v6 = vrot.slane %v580_v0, 5  ;;  %v548_v8 = vrot.slane %v539_v17, 7  ;;  %v549_v9 = vrot.slane %v538_v7, 6 }
 0x186   :  { %v591_v13 = vsel %vm290_vm9, %v588_v5, %v589_v6  ;;  %v551_v14 = vsel %vm260_vm4, %v540_v20, %v548_v8  ;;  %v552_v10 = vsel %vm290_vm9, %v549_v9, %v550_v12 }
 0x187   :  { %v553_v22 = vsel %vm292_vm10, %v551_v14, %v552_v10  ;;  %v879_v10 = vld [vmem:[#allocation7 + $0x30] sm:$0xf] }
 0x188   :  { %v486_v24 = vld [vmem:[#allocation1 + $0x1] ss:$9 sm:$0xff] }
 0x189   :  { %520 = vst [vmem:[#allocation1] sm:$0xff] %v501_v42  ;;  %v488_v25 = vmul.f32 %v486_v24, %v480_v27  ;;  %v555_v42 = vmul.f32 %v553_v22, %v543_v18 }
 0x18a   :  { %521 = vst [vmem:[#allocation1 + $0x9] sm:$0xff] %v2962_v33  ;;  %v571_v30 = vpop.permute.xlu1 %570 }
 0x18b   :  { %v489_v31 = vadd.f32 %v488_v25, %v478_v3  ;;  %522 = vst [vmem:[#allocation1 + $0x12] sm:$0xff] %v499_v51  ;;  %v578_v26 = vsel %vm576_vm2, %v571_v30, %v573_v37  ;;  %v579_v35 = vsel %vm576_vm2, %v569_v47, %v571_v30  ;;  %v167_v37 = vpop.f32.mrf.mxu2 }
 0x18c   :  { %523 = vst [vmem:[#allocation1 + $0x1b] sm:$0xff] %v502_v52  ;;  %v587_v16 = vrot.slane %v578_v26, 7  ;;  %v739_v52 = vld [vmem:[#allocation7 + $0x28] sm:$0xf] }
 0x18d   :  { %v517_v32 = vadd.f32 %v516_v29, %v489_v31 }
 0x18e   :  { %v590_v36 = vsel %vm260_vm4, %v579_v35, %v587_v16 }
 0x18f   :  { %v592_v38 = vsel %vm292_vm10, %v590_v36, %v591_v13 }
 0x190   :  { %v594_v48 = vmul.f32 %v592_v38, %v582_v46  ;;  %v2197_v46 = vld [vmem:[#allocation7 + $0x50] sm:$0xf] }
 0x192   :  { %v74_v61 = vpop.permute.xlu1 %73 }
 0x193   :  { %v525_v41 = vld [vmem:[#allocation1 + $0x1] ss:$9 sm:$0xff]  ;;  %v168_v4 = vadd.f32 %v167_v37, %v74_v61  ;;  %v122_v21 = vadd.f32 %v121_v45, %v74_v61  ;;  %v145_v14 = vadd.f32 %v144_v56, %v74_v61 }
 0x194   :  { %v527_v33 = vmul.f32 %v525_v41, %v519_v39  ;;  %560 = vst [vmem:[#allocation1 + $0x9] sm:$0xff] %v539_v17  ;;  %v191_v17 = vadd.f32 %v190_v59, %v74_v61  ;;  %v1111_v61 = vld [vmem:[#allocation7 + $0x58] sm:$0xf] }
 0x195   :  { %561 = vst [vmem:[#allocation1 + $0x12] sm:$0xff] %v538_v7  ;;  %v880_v7 = vld [vmem:[#allocation7 + $0x38] sm:$0xf] }
 0x196   :  { %v528_v43 = vadd.f32 %v527_v33, %v517_v32  ;;  %559 = vst [vmem:[#allocation1] sm:$0xff] %v540_v20 }
 0x197   :  { %562 = vst [vmem:[#allocation1 + $0x1b] sm:$0xff] %v541_v62 }
 0x198   :  { %v556_v44 = vadd.f32 %v555_v42, %v528_v43 }
 0x19e   :  { %v564_v34 = vld [vmem:[#allocation1 + $0x1] ss:$9 sm:$0xff] }
 0x19f   :  { %v566_v47 = vmul.f32 %v564_v34, %v558_v28  ;;  %598 = vst [vmem:[#allocation1] sm:$0xff] %v579_v35 }
 0x1a0   :  { %599 = vst [vmem:[#allocation1 + $0x9] sm:$0xff] %v578_v26  ;;  %v1075_v26 = vpop.permute.xlu0 %1074 }
 0x1a1   :  { %v567_v40 = vadd.f32 %v566_v47, %v556_v44  ;;  %600 = vst [vmem:[#allocation1 + $0x12] sm:$0xff] %v577_v63 }
 0x1a2   :  { %601 = vst [vmem:[#allocation1 + $0x1b] sm:$0xff] %v580_v0 }
 0x1a3   :  { %v595_v15 = vadd.f32 %v594_v48, %v567_v40  ;;  %v735_v49 = vpop.f32.mrf.mxu0  ;;  %v1125_v40 = vld [vmem:[#allocation5 + $0x1] ss:$8 sm:$0xf] }
 0x1a4   :  { %v738_v51 = vmax.f32 %v735_v49, 0.0  ;;  %v1130_v49 = vperm.slane %v1125_v40, 3  ;;  %v1128_v37 = vperm.slane %v1125_v40, 1  ;;  %v1129_v59 = vperm.slane %v1125_v40, 2 }
 0x1a6   :  { %2419 = vmatpush.msk.msrb.mxu1 %vm292_vm10, %v738_v51 }
 0x1a7   :  { %2420 = vmatmul.msk.f32.vlgmr.msrb.gmra.mxu1 %vm740_vm3, %v739_v52 }
 0x1a8   :  { %2427 = vmatpush.msk.msra.mxu1 %vm292_vm10, %v770_v55  ;;  %v1139_v55 = vld [vmem:[#allocation7 + $0x60] sm:$0xf] }
 0x1a9   :  { %v603_v58 = vld [vmem:[#allocation1 + $0x1] ss:$9 sm:$0xff] }
 0x1aa   :  { %v605_v50 = vmul.f32 %v603_v58, %v597_v57 }
 0x1ac   :  { %v606_v60 = vadd.f32 %v605_v50, %v595_v15  ;;  %v1127_v15 = vperm.slane %v1125_v40, 0 }
 0x1ae   :  { %v869_v62 = vperm.slane %v606_v60, 2  ;;  %v870_v63 = vperm.slane %v606_v60, 3  ;;  %v867_v12 = vperm.slane %v606_v60, 0  ;;  %v868_v8 = vperm.slane %v606_v60, 1 }
 0x224   :  { %v764_v11 = vpop.f32.mrf.mxu1 }
 0x225   :  { %2422 = vmatmul.msk.f32.vlgmr.msrb.gmra.mxu2 %vm740_vm3, %v764_v11  ;;  %2424 = vmatmul.msk.f32.vlgmr.msrb.gmra.mxu3 %vm740_vm3, %v764_v11 }
 0x226   :  { %2426 = vmatmul.msk.f32.vlgmr.msra.gmra.mxu0 %vm740_vm3, %v764_v11  ;;  %2428 = vmatmul.msk.f32.vlgmr.msra.gmra.mxu1 %vm740_vm3, %v764_v11  ;;  %v1097_v11 = vld [vmem:[#allocation5] ss:$8 sm:$0xf] }
 0x227   :  { %v1099_v57 = vperm.slane %v1097_v11, 0 }
 0x2a3   :  { %v843_v0 = vpop.f32.mrf.mxu0  ;;  %v863_v3 = vpop.f32.mrf.mxu1 }
 0x2a4   :  { %v877_v5 = vmul.f32 %v869_v62, %v843_v0  ;;  %v878_v6 = vmul.f32 %v870_v63, %v863_v3 }
 0x2a6   :  { %2433 = vmatpush.msk.msrb.mxu0 %vm92_vm0, %v877_v5  ;;  %2435 = vmatpush.msk.msrb.mxu1 %vm92_vm0, %v878_v6 }
 0x2a7   :  { %2434 = vmatmul.msk.f32.vlgmr.msrb.gmra.mxu0 %vm85_vm1, %v880_v7  ;;  %2436 = vmatmul.msk.f32.vlgmr.msrb.gmra.mxu1 %vm85_vm1, %v880_v7 }
 0x2a8   :  { %v803_v9 = vpop.f32.mrf.mxu2  ;;  %v823_v13 = vpop.f32.mrf.mxu3  ;;  %2443 = vmatpush.msk.msra.mxu1 %vm92_vm0, %v191_v17  ;;  %2441 = vmatpush.msk.msra.mxu0 %vm92_vm0, %v168_v4 }
 0x2a9   :  { %v875_v20 = vmul.f32 %v867_v12, %v803_v9  ;;  %v876_v27 = vmul.f32 %v868_v8, %v823_v13 }
 0x2ab   :  { %2429 = vmatpush.msk.msra.mxu2 %vm92_vm0, %v875_v20  ;;  %2431 = vmatpush.msk.msra.mxu3 %vm92_vm0, %v876_v27  ;;  %v1100_v20 = vperm.slane %v1097_v11, 1  ;;  %v1101_v27 = vperm.slane %v1097_v11, 2 }
 0x2ac   :  { %2430 = vmatmul.msk.f32.vlgmr.msra.gmra.mxu2 %vm85_vm1, %v880_v7  ;;  %2432 = vmatmul.msk.f32.vlgmr.msra.gmra.mxu3 %vm85_vm1, %v880_v7  ;;  %v1102_v7 = vperm.slane %v1097_v11, 3 }
 0x2ad   :  { %2437 = vmatpush.msk.msrb.mxu2 %vm92_vm0, %v122_v21  ;;  %2439 = vmatpush.msk.msrb.mxu3 %vm92_vm0, %v145_v14 }
 0x2af   :  { %2442 = vmatmul.msk.f32.vlgmr.msra.gmra.mxu0 %vm85_vm1, %v879_v10  ;;  %2444 = vmatmul.msk.f32.vlgmr.msra.gmra.mxu1 %vm85_vm1, %v879_v10 }
 0x2b4   :  { %2438 = vmatmul.msk.f32.vlgmr.msrb.gmra.mxu2 %vm85_vm1, %v879_v10  ;;  %2440 = vmatmul.msk.f32.vlgmr.msrb.gmra.mxu3 %vm85_vm1, %v879_v10  ;;  %v1343_v10 = vld [vmem:[#allocation5 + $0x2] ss:$8 sm:$0xf] }
 0x324   :  { %v953_v22 = vpop.f32.mrf.mxu0  ;;  %v973_v24 = vpop.f32.mrf.mxu1 }
 0x32c   :  { %v1048_v25 = vpop.f32.mrf.mxu0  ;;  %v1068_v29 = vpop.f32.mrf.mxu1 }
 0x32d   :  { %v1049_v30 = vadd.f32 %v1048_v25, %v953_v22  ;;  %v1069_v31 = vadd.f32 %v1068_v29, %v973_v24  ;;  %v1470_v22 = vld [vmem:[#allocation5 + $0x3] ss:$8 sm:$0xf] }
 0x32f   :  { %v1079_v16 = vadd.f32 %v1075_v26, %v1049_v30  ;;  %v1080_v32 = vadd.f32 %v1075_v26, %v1069_v31  ;;  %v913_v35 = vpop.f32.mrf.mxu2  ;;  %v933_v36 = vpop.f32.mrf.mxu3  ;;  %v1347_v31 = vperm.slane %v1343_v10, 2 }
 0x331   :  { %v3042_v38 = vmax.f32 %v1079_v16, 0.0  ;;  %v3044_v39 = vmax.f32 %v1080_v32, 0.0  ;;  %v1474_v16 = vperm.slane %v1470_v22, 2 }
 0x333   :  { %1118 = vrot.lane.b32.xlu0 %v3044_v39, %s2679_s2  ;;  %1116 = vrot.lane.b32.xlu2 %v3042_v38, %s2679_s2 }
 0x337   :  { %v1008_v18 = vpop.f32.mrf.mxu2  ;;  %v1028_v41 = vpop.f32.mrf.mxu3 }
 0x338   :  { %v1009_v33 = vadd.f32 %v1008_v18, %v913_v35  ;;  %v1029_v42 = vadd.f32 %v1028_v41, %v933_v36  ;;  %v1345_v41 = vperm.slane %v1343_v10, 0 }
 0x33a   :  { %v1077_v43 = vadd.f32 %v1075_v26, %v1009_v33  ;;  %v1078_v44 = vadd.f32 %v1075_v26, %v1029_v42  ;;  %v1348_v26 = vperm.slane %v1343_v10, 3  ;;  %v1346_v33 = vperm.slane %v1343_v10, 1  ;;  %v1951_v10 = vld [vmem:[#allocation5 + $0x7] ss:$8 sm:$0xf] }
 0x33b   :  { %1091 = vrot.lane.b32.xlu0 %v3044_v39, %s2678_s0 }
 0x33c   :  { %v3052_v45 = vmax.f32 %v1077_v43, 0.0  ;;  %v3054_v28 = vmax.f32 %v1078_v44, 0.0  ;;  %v1357_v44 = vld [vmem:[#allocation7 + $0x68] sm:$0xf] }
 0x33e   :  { %1114 = vrot.lane.b32.xlu1 %v3054_v28, %s2679_s2  ;;  %1112 = vrot.lane.b32.xlu2 %v3052_v45, %s2679_s2 }
 0x343   :  { %1332 = vrot.lane.b32.xlu0 %v3054_v28, %s2681_s4 }
 0x346   :  { %1089 = vrot.lane.b32.xlu1 %v3042_v38, %s2678_s0  ;;  %1085 = vrot.lane.b32.xlu2 %v3052_v45, %s2678_s0 }
 0x34b   :  { %1457 = vrot.lane.b32.xlu0 %v3052_v45, %s2680_s30 }
 0x34e   :  { %1087 = vrot.lane.b32.xlu1 %v3054_v28, %s2678_s0  ;;  %1336 = vrot.lane.b32.xlu2 %v3044_v39, %s2681_s4 }
 0x353   :  { %1334 = vrot.lane.b32.xlu0 %v3042_v38, %s2681_s4 }
 0x356   :  { %1330 = vrot.lane.b32.xlu1 %v3052_v45, %s2681_s4  ;;  %1459 = vrot.lane.b32.xlu2 %v3054_v28, %s2680_s30 }
 0x35b   :  { %1688 = vrot.lane.b32.xlu0 %v3042_v38, %s2683_s6 }
 0x35e   :  { %1463 = vrot.lane.b32.xlu1 %v3044_v39, %s2680_s30  ;;  %1461 = vrot.lane.b32.xlu2 %v3042_v38, %s2680_s30 }
 0x363   :  { %1815 = vrot.lane.b32.xlu0 %v3042_v38, %s2682_s5 }
 0x366   :  { %1690 = vrot.lane.b32.xlu1 %v3044_v39, %s2683_s6  ;;  %1684 = vrot.lane.b32.xlu2 %v3052_v45, %s2683_s6 }
 0x36b   :  { %1940 = vrot.lane.b32.xlu0 %v3054_v28, %s2684_s7 }
 0x36e   :  { %1686 = vrot.lane.b32.xlu1 %v3054_v28, %s2683_s6  ;;  %1811 = vrot.lane.b32.xlu2 %v3052_v45, %s2682_s5 }
 0x373   :  { %1817 = vrot.lane.b32.xlu0 %v3044_v39, %s2682_s5 }
 0x376   :  { %1813 = vrot.lane.b32.xlu1 %v3054_v28, %s2682_s5  ;;  %1942 = vrot.lane.b32.xlu2 %v3042_v38, %s2684_s7 }
 0x37b   :  { %2065 = vrot.lane.b32.xlu0 %v3052_v45, %s2685_s8 }
 0x37e   :  { %1938 = vrot.lane.b32.xlu1 %v3052_v45, %s2684_s7  ;;  %2067 = vrot.lane.b32.xlu2 %v3054_v28, %s2685_s8 }
 0x383   :  { %2200 = vperm.xlu0 %2547, %v2197_v46  }
 0x386   :  { %2069 = vrot.lane.b32.xlu1 %v3042_v38, %s2685_s8  ;;  %1944 = vrot.lane.b32.xlu2 %v3044_v39, %s2684_s7 }
 0x38d   :  { %v1117_v34 = vpop.permute.xlu2 %1116 }
 0x38e   :  { %2071 = vrot.lane.b32.xlu1 %v3044_v39, %s2685_s8 }
 0x398   :  { %v1113_v47 = vpop.permute.xlu2 %1112 }
 0x3a0   :  { %v1086_v48 = vpop.permute.xlu2 %1085 }
 0x3a5   :  { %v1119_v51 = vpop.permute.xlu0 %1118 }
 0x3a6   :  { %v1120_v52 = vsel %vm316_vm8, %v1117_v34, %v1119_v51  ;;  %v1123_v19 = vsel %vm316_vm8, %v1119_v51, %v1113_v47 }
 0x3a7   :  { %v1135_v54 = vmul.f32 %v1127_v15, %v1123_v19  ;;  %v1138_v23 = vmul.f32 %v1130_v49, %v1120_v52 }
 0x3a8   :  { %v3118_v56 = vpop.permute.xlu2 %1336 }
 0x3a9   :  { %2445 = vmatpush.msk.msra.mxu2 %vm92_vm0, %v1135_v54  ;;  %2451 = vmatpush.msk.msrb.mxu1 %vm92_vm0, %v1138_v23  ;;  %v1472_v23 = vperm.slane %v1470_v22, 0 }
 0x3aa   :  { %2446 = vmatmul.msk.f32.vlgmr.msra.gmra.mxu2 %vm85_vm1, %v1139_v55  ;;  %2452 = vmatmul.msk.f32.vlgmr.msrb.gmra.mxu1 %vm85_vm1, %v1139_v55 }
 0x3ad   :  { %v1092_v58 = vpop.permute.xlu0 %1091 }
 0x3ae   :  { %v1096_v50 = vsel %vm275_vm7, %v1092_v58, %v1086_v48 }
 0x3af   :  { %v1107_v60 = vmul.f32 %v1099_v57, %v1096_v50 }
 0x3b0   :  { %v1115_v62 = vpop.permute.xlu1 %1114  ;;  %v1460_v63 = vpop.permute.xlu2 %1459 }
 0x3b1   :  { %v1121_v0 = vsel %vm316_vm8, %v1115_v62, %v1117_v34  ;;  %v1122_v3 = vsel %vm316_vm8, %v1113_v47, %v1115_v62  ;;  %2453 = vmatpush.msk.msrb.mxu2 %vm92_vm0, %v1107_v60  ;;  %v1473_v34 = vperm.slane %v1470_v22, 1  ;;  %v1697_v60 = vld [vmem:[#allocation5 + $0x5] ss:$8 sm:$0xf] }
 0x3b2   :  { %v1136_v4 = vmul.f32 %v1128_v37, %v1122_v3  ;;  %v1137_v5 = vmul.f32 %v1129_v59, %v1121_v0  ;;  %2454 = vmatmul.msk.f32.vlgmr.msrb.gmra.mxu2 %vm85_vm1, %v1111_v61  ;;  %v1484_v59 = vld [vmem:[#allocation7 + $0x70] sm:$0xf] }
 0x3b4   :  { %2447 = vmatpush.msk.msra.mxu3 %vm92_vm0, %v1136_v4  ;;  %2449 = vmatpush.msk.msrb.mxu0 %vm92_vm0, %v1137_v5 }
 0x3b5   :  { %v1333_v6 = vpop.permute.xlu0 %1332  ;;  %2448 = vmatmul.msk.f32.vlgmr.msra.gmra.mxu3 %vm85_vm1, %v1139_v55  ;;  %2450 = vmatmul.msk.f32.vlgmr.msrb.gmra.mxu0 %vm85_vm1, %v1139_v55  ;;  %v1475_v55 = vperm.slane %v1470_v22, 3 }
 0x3b8   :  { %v1090_v17 = vpop.permute.xlu1 %1089  ;;  %v1462_v12 = vpop.permute.xlu2 %1461 }
 0x3b9   :  { %v1093_v8 = vsel %vm275_vm7, %v1090_v17, %v1092_v58  ;;  %v1466_v32 = vsel %vm394_vm11, %v1460_v63, %v1462_v12 }
 0x3ba   :  { %v1110_v9 = vmul.f32 %v1102_v7, %v1093_v8  ;;  %v1482_v46 = vmul.f32 %v1474_v16, %v1466_v32  ;;  %v1700_v7 = vperm.slane %v1697_v60, 1 }
 0x3bc   :  { %2459 = vmatpush.msk.msra.mxu1 %vm92_vm0, %v1110_v9 }
 0x3bd   :  { %v1458_v13 = vpop.permute.xlu0 %1457  ;;  %2460 = vmatmul.msk.f32.vlgmr.msra.gmra.mxu1 %vm85_vm1, %v1111_v61 }
 0x3be   :  { %v1467_v40 = vsel %vm394_vm11, %v1458_v13, %v1460_v63 }
 0x3bf   :  { %v1481_v19 = vmul.f32 %v1473_v34, %v1467_v40  ;;  %v1838_v34 = vld [vmem:[#allocation7 + $0x88] sm:$0xf]  ;;  %v1953_v40 = vperm.slane %v1951_v10, 0 }
 0x3c0   :  { %v1088_v21 = vpop.permute.xlu1 %1087  ;;  %v3140_v14 = vpop.permute.xlu2 %1684 }
 0x3c1   :  { %v1094_v24 = vsel %vm275_vm7, %v1088_v21, %v1090_v17  ;;  %v1095_v25 = vsel %vm275_vm7, %v1086_v48, %v1088_v21  ;;  %v1711_v21 = vld [vmem:[#allocation7 + $0x80] sm:$0xf] }
 0x3c2   :  { %v1108_v29 = vmul.f32 %v1100_v20, %v1095_v25  ;;  %v1109_v30 = vmul.f32 %v1101_v27, %v1094_v24  ;;  %v1955_v25 = vperm.slane %v1951_v10, 2 }
 0x3c4   :  { %2457 = vmatpush.msk.msra.mxu0 %vm92_vm0, %v1109_v30  ;;  %2455 = vmatpush.msk.msrb.mxu3 %vm92_vm0, %v1108_v29 }
 0x3c5   :  { %v1335_v35 = vpop.permute.xlu0 %1334  ;;  %2456 = vmatmul.msk.f32.vlgmr.msrb.gmra.mxu3 %vm85_vm1, %v1111_v61  ;;  %2458 = vmatmul.msk.f32.vlgmr.msra.gmra.mxu0 %vm85_vm1, %v1111_v61  ;;  %v1702_v61 = vperm.slane %v1697_v60, 3 }
 0x3c6   :  { %v1338_v36 = vsel %vm355_vm12, %v1335_v35, %v3118_v56  ;;  %v1339_v18 = vsel %vm355_vm12, %v1333_v6, %v1335_v35 }
 0x3c7   :  { %v1355_v42 = vmul.f32 %v1347_v31, %v1339_v18  ;;  %v1356_v43 = vmul.f32 %v1348_v26, %v1338_v36 }
 0x3c8   :  { %v1331_v47 = vpop.permute.xlu1 %1330  ;;  %v3157_v48 = vpop.permute.xlu2 %1811 }
 0x3c9   :  { %2465 = vmatpush.msk.msrb.mxu0 %vm92_vm0, %v1355_v42  ;;  %v1340_v15 = vsel %vm355_vm12, %v1331_v47, %v1333_v6  ;;  %v1341_v49 = vsel %vm355_vm12, %v3118_v56, %v1331_v47  ;;  %2467 = vmatpush.msk.msrb.mxu1 %vm92_vm0, %v1356_v43  ;;  %v1584_v6 = vld [vmem:[#allocation7 + $0x78] sm:$0xf] }
 0x3ca   :  { %v1353_v51 = vmul.f32 %v1345_v41, %v1341_v49  ;;  %v1354_v52 = vmul.f32 %v1346_v33, %v1340_v15  ;;  %2468 = vmatmul.msk.f32.vlgmr.msrb.gmra.mxu1 %vm85_vm1, %v1357_v44  ;;  %v1954_v41 = vperm.slane %v1951_v10, 1  ;;  %v1956_v15 = vperm.slane %v1951_v10, 3 }
 0x3cb   :  { %2473 = vmatpush.msk.msra.mxu0 %vm92_vm0, %v1482_v46 }
 0x3cc   :  { %2461 = vmatpush.msk.msra.mxu2 %vm92_vm0, %v1353_v51  ;;  %2463 = vmatpush.msk.msra.mxu3 %vm92_vm0, %v1354_v52 }
 0x3cd   :  { %v1689_v54 = vpop.permute.xlu0 %1688  ;;  %2462 = vmatmul.msk.f32.vlgmr.msra.gmra.mxu2 %vm85_vm1, %v1357_v44  ;;  %2464 = vmatmul.msk.f32.vlgmr.msra.gmra.mxu3 %vm85_vm1, %v1357_v44 }
 0x3ce   :  { %2466 = vmatmul.msk.f32.vlgmr.msrb.gmra.mxu0 %vm85_vm1, %v1357_v44  ;;  %2471 = vmatpush.msk.msrb.mxu3 %vm92_vm0, %v1481_v19 }
 0x3cf   :  { %2481 = vmatpush.msk.msrb.mxu0 %vm92_vm0, %v3042_v38 }
 0x3d0   :  { %2479 = vmatpush.msk.msra.mxu3 %vm92_vm0, %v3054_v28  ;;  %v1464_v56 = vpop.permute.xlu1 %1463  ;;  %v3180_v11 = vpop.permute.xlu2 %1942  ;;  %v1701_v28 = vperm.slane %v1697_v60, 2 }
 0x3d1   :  { %v1465_v57 = vsel %vm394_vm11, %v1462_v12, %v1464_v56  ;;  %v1468_v58 = vsel %vm394_vm11, %v1464_v56, %v1458_v13  ;;  %v1824_v12 = vld [vmem:[#allocation5 + $0x6] ss:$8 sm:$0xf] }
 0x3d2   :  { %v1480_v50 = vmul.f32 %v1472_v23, %v1468_v58  ;;  %v1483_v37 = vmul.f32 %v1475_v55, %v1465_v57  ;;  %v1828_v22 = vperm.slane %v1824_v12, 2  ;;  %v1829_v24 = vperm.slane %v1824_v12, 3 }
 0x3d3   :  { %v1826_v26 = vperm.slane %v1824_v12, 0  ;;  %v1827_v16 = vperm.slane %v1824_v12, 1 }
 0x3d4   :  { %2469 = vmatpush.msk.msrb.mxu2 %vm92_vm0, %v1480_v50  ;;  %2475 = vmatpush.msk.msra.mxu1 %vm92_vm0, %v1483_v37 }
 0x3d5   :  { %v1816_v38 = vpop.permute.xlu0 %1815  ;;  %2470 = vmatmul.msk.f32.vlgmr.msrb.gmra.mxu2 %vm85_vm1, %v1484_v59  ;;  %2472 = vmatmul.msk.f32.vlgmr.msrb.gmra.mxu3 %vm85_vm1, %v1484_v59 }
 0x3d6   :  { %2474 = vmatmul.msk.f32.vlgmr.msra.gmra.mxu0 %vm85_vm1, %v1484_v59  ;;  %2476 = vmatmul.msk.f32.vlgmr.msra.gmra.mxu1 %vm85_vm1, %v1484_v59 }
 0x3d7   :  { %2477 = vmatpush.msk.msra.mxu2 %vm92_vm0, %v3052_v45  ;;  %2483 = vmatpush.msk.msrb.mxu1 %vm92_vm0, %v3044_v39  ;;  %v1699_v39 = vperm.slane %v1697_v60, 0  ;;  %v2092_v60 = vld [vmem:[#allocation7 + $0x98] sm:$0xf] }
 0x3d8   :  { %v1691_v62 = vpop.permute.xlu1 %1690  ;;  %v3196_v63 = vpop.permute.xlu2 %2067 }
 0x3d9   :  { %v1692_v0 = vsel %vm459_vm13, %v1689_v54, %v1691_v62  ;;  %v1695_v3 = vsel %vm459_vm13, %v1691_v62, %v3140_v14 }
 0x3da   :  { %v1709_v4 = vmul.f32 %v1701_v28, %v1692_v0  ;;  %v1710_v5 = vmul.f32 %v1702_v61, %v1695_v3 }
 0x3dc   :  { %2489 = vmatpush.msk.msra.mxu0 %vm92_vm0, %v1709_v4  ;;  %2491 = vmatpush.msk.msra.mxu1 %vm92_vm0, %v1710_v5 }
 0x3dd   :  { %v1941_v45 = vpop.permute.xlu0 %1940  ;;  %2478 = vmatmul.msk.f32.vlgmr.msra.gmra.mxu2 %vm85_vm1, %v1584_v6  ;;  %2480 = vmatmul.msk.f32.vlgmr.msra.gmra.mxu3 %vm85_vm1, %v1584_v6 }
 0x3de   :  { %2482 = vmatmul.msk.f32.vlgmr.msrb.gmra.mxu0 %vm85_vm1, %v1584_v6  ;;  %2484 = vmatmul.msk.f32.vlgmr.msrb.gmra.mxu1 %vm85_vm1, %v1584_v6  ;;  %v1947_v43 = vsel %vm537_vm15, %v1941_v45, %v3180_v11 }
 0x3df   :  { %v1962_v47 = vmul.f32 %v1954_v41, %v1947_v43 }
 0x3e0   :  { %v1687_v17 = vpop.permute.xlu1 %1686  ;;  %v1945_v27 = vpop.permute.xlu2 %1944 }
 0x3e1   :  { %v1693_v8 = vsel %vm459_vm13, %v1687_v17, %v1689_v54  ;;  %v1694_v9 = vsel %vm459_vm13, %v3140_v14, %v1687_v17  ;;  %v1946_v29 = vsel %vm537_vm15, %v3180_v11, %v1945_v27  ;;  %v1965_v11 = vld [vmem:[#allocation7 + $0x90] sm:$0xf] }
 0x3e2   :  { %v1707_v13 = vmul.f32 %v1699_v39, %v1694_v9  ;;  %v1708_v20 = vmul.f32 %v1700_v7, %v1693_v8  ;;  %v1963_v36 = vmul.f32 %v1955_v25, %v1946_v29 }
 0x3e4   :  { %2485 = vmatpush.msk.msrb.mxu2 %vm92_vm0, %v1707_v13  ;;  %2487 = vmatpush.msk.msrb.mxu3 %vm92_vm0, %v1708_v20 }
 0x3e5   :  { %v1818_v30 = vpop.permute.xlu0 %1817  ;;  %2486 = vmatmul.msk.f32.vlgmr.msrb.gmra.mxu2 %vm85_vm1, %v1711_v21  ;;  %2488 = vmatmul.msk.f32.vlgmr.msrb.gmra.mxu3 %vm85_vm1, %v1711_v21 }
 0x3e6   :  { %v1819_v14 = vsel %vm498_vm14, %v1816_v38, %v1818_v30  ;;  %v1822_v31 = vsel %vm498_vm14, %v1818_v30, %v3157_v48  ;;  %2490 = vmatmul.msk.f32.vlgmr.msra.gmra.mxu0 %vm85_vm1, %v1711_v21  ;;  %2492 = vmatmul.msk.f32.vlgmr.msra.gmra.mxu1 %vm85_vm1, %v1711_v21 }
 0x3e7   :  { %v1836_v32 = vmul.f32 %v1828_v22, %v1819_v14  ;;  %v1837_v35 = vmul.f32 %v1829_v24, %v1822_v31 }
 0x3e8   :  { %v1814_v18 = vpop.permute.xlu1 %1813 }
 0x3e9   :  { %v1820_v33 = vsel %vm498_vm14, %v1814_v18, %v1816_v38  ;;  %v1821_v42 = vsel %vm498_vm14, %v3157_v48, %v1814_v18  ;;  %2497 = vmatpush.msk.msrb.mxu0 %vm92_vm0, %v1836_v32  ;;  %2499 = vmatpush.msk.msrb.mxu1 %vm92_vm0, %v1837_v35  ;;  %v2078_v48 = vld [vmem:[#allocation5 + $0x20] ss:$8 sm:$0xf] }
 0x3ea   :  { %v1834_v44 = vmul.f32 %v1826_v26, %v1821_v42  ;;  %v1835_v46 = vmul.f32 %v1827_v16, %v1820_v33  ;;  %v2080_v52 = vperm.slane %v2078_v48, 0  ;;  %v2081_v58 = vperm.slane %v2078_v48, 1 }
 0x3eb   :  { %2505 = vmatpush.msk.msra.mxu0 %vm92_vm0, %v1963_v36  ;;  %v2082_v38 = vperm.slane %v2078_v48, 2  ;;  %v2083_v28 = vperm.slane %v2078_v48, 3 }
 0x3ec   :  { %2493 = vmatpush.msk.msra.mxu2 %vm92_vm0, %v1834_v44  ;;  %2495 = vmatpush.msk.msra.mxu3 %vm92_vm0, %v1835_v46 }
 0x3ed   :  { %2494 = vmatmul.msk.f32.vlgmr.msra.gmra.mxu2 %vm85_vm1, %v1838_v34  ;;  %2496 = vmatmul.msk.f32.vlgmr.msra.gmra.mxu3 %vm85_vm1, %v1838_v34  ;;  %v2066_v49 = vpop.permute.xlu0 %2065 }
 0x3ee   :  { %2498 = vmatmul.msk.f32.vlgmr.msrb.gmra.mxu0 %vm85_vm1, %v1838_v34  ;;  %2500 = vmatmul.msk.f32.vlgmr.msrb.gmra.mxu1 %vm85_vm1, %v1838_v34  ;;  %v2075_v23 = vsel %vm576_vm2, %v2066_v49, %v3196_v63 }
 0x3ef   :  { %2503 = vmatpush.msk.msrb.mxu3 %vm92_vm0, %v1962_v47  ;;  %v2088_v57 = vmul.f32 %v2080_v52, %v2075_v23 }
 0x3f0   :  { %v1939_v51 = vpop.permute.xlu1 %1938 }
 0x3f1   :  { %v1948_v19 = vsel %vm537_vm15, %v1939_v51, %v1941_v45  ;;  %v1949_v54 = vsel %vm537_vm15, %v1945_v27, %v1939_v51 }
 0x3f2   :  { %v1961_v55 = vmul.f32 %v1953_v40, %v1948_v19  ;;  %v1964_v56 = vmul.f32 %v1956_v15, %v1949_v54 }
 0x3f4   :  { %2501 = vmatpush.msk.msrb.mxu2 %vm92_vm0, %v1961_v55  ;;  %2507 = vmatpush.msk.msra.mxu1 %vm92_vm0, %v1964_v56 }
 0x3f5   :  { %2502 = vmatmul.msk.f32.vlgmr.msrb.gmra.mxu2 %vm85_vm1, %v1965_v11  ;;  %2504 = vmatmul.msk.f32.vlgmr.msrb.gmra.mxu3 %vm85_vm1, %v1965_v11 }
 0x3f6   :  { %2506 = vmatmul.msk.f32.vlgmr.msra.gmra.mxu0 %vm85_vm1, %v1965_v11  ;;  %2508 = vmatmul.msk.f32.vlgmr.msra.gmra.mxu1 %vm85_vm1, %v1965_v11 }
 0x3f7   :  { %2509 = vmatpush.msk.msra.mxu2 %vm92_vm0, %v2088_v57 }
 0x3f8   :  { %v2070_v50 = vpop.permute.xlu1 %2069 }
 0x3f9   :  { %v2074_v37 = vsel %vm576_vm2, %v3196_v63, %v2070_v50 }
 0x3fa   :  { %v2089_v59 = vmul.f32 %v2081_v58, %v2074_v37 }
 0x3fc   :  { %2511 = vmatpush.msk.msra.mxu3 %vm92_vm0, %v2089_v59 }
 0x3fd   :  { %2510 = vmatmul.msk.f32.vlgmr.msra.gmra.mxu2 %vm85_vm1, %v2092_v60  ;;  %2512 = vmatmul.msk.f32.vlgmr.msra.gmra.mxu3 %vm85_vm1, %v2092_v60 }
 0x400   :  { %v2072_v61 = vpop.permute.xlu1 %2071 }
 0x401   :  { %v2073_v62 = vsel %vm576_vm2, %v2070_v50, %v2072_v61  ;;  %v2076_v0 = vsel %vm576_vm2, %v2072_v61, %v2066_v49 }
 0x402   :  { %v2090_v3 = vmul.f32 %v2082_v38, %v2073_v62  ;;  %v2091_v4 = vmul.f32 %v2083_v28, %v2076_v0 }
 0x404   :  { %2513 = vmatpush.msk.msrb.mxu0 %vm92_vm0, %v2090_v3  ;;  %2515 = vmatpush.msk.msrb.mxu1 %vm92_vm0, %v2091_v4 }
 0x405   :  { %2514 = vmatmul.msk.f32.vlgmr.msrb.gmra.mxu0 %vm85_vm1, %v2092_v60  ;;  %2516 = vmatmul.msk.f32.vlgmr.msrb.gmra.mxu1 %vm85_vm1, %v2092_v60 }
 0x427   :  { %v1232_v63 = vpop.f32.mrf.mxu1 }
 0x42d   :  { %v1172_v6 = vpop.f32.mrf.mxu2 }
 0x432   :  { %v1212_v5 = vpop.f32.mrf.mxu0 }
 0x435   :  { %v1267_v17 = vpop.f32.mrf.mxu2 }
 0x436   :  { %v1268_v33 = vadd.f32 %v1267_v17, %v1172_v6 }
 0x438   :  { %v1192_v45 = vpop.f32.mrf.mxu3 }
 0x43a   :  { %v1327_v39 = vpop.f32.mrf.mxu1 }
 0x43b   :  { %v1328_v41 = vadd.f32 %v1327_v39, %v1232_v63 }
 0x442   :  { %v1307_v7 = vpop.f32.mrf.mxu0 }
 0x443   :  { %v1308_v18 = vadd.f32 %v1307_v7, %v1212_v5 }
 0x447   :  { %v1450_v8 = vpop.f32.mrf.mxu1 }
 0x448   :  { %v1287_v12 = vpop.f32.mrf.mxu3  ;;  %v1456_v34 = vadd.f32 %v1450_v8, %v1328_v41 }
 0x449   :  { %v1288_v42 = vadd.f32 %v1287_v12, %v1192_v45 }
 0x44b   :  { %v1430_v53 = vpop.f32.mrf.mxu0 }
 0x44c   :  { %v1455_v46 = vadd.f32 %v1430_v53, %v1308_v18  ;;  %v2196_v53 = vld [vmem:[#allocation7 + $0x48] sm:$0xf] }
 0x450   :  { %v1390_v9 = vpop.f32.mrf.mxu2  ;;  %v1410_v13 = vpop.f32.mrf.mxu3 }
 0x451   :  { %v1453_v43 = vadd.f32 %v1390_v9, %v1268_v33  ;;  %v1454_v44 = vadd.f32 %v1410_v13, %v1288_v42  ;;  %v2201_v13 = vpop.permute.xlu0 %2200 }
 0x453   :  { %v1557_v20 = vpop.f32.mrf.mxu0  ;;  %v1577_v27 = vpop.f32.mrf.mxu1 }
 0x454   :  { %v1582_v49 = vadd.f32 %v1557_v20, %v1455_v46  ;;  %v1583_v51 = vadd.f32 %v1577_v27, %v1456_v34 }
 0x458   :  { %v1517_v21 = vpop.f32.mrf.mxu2  ;;  %v1537_v10 = vpop.f32.mrf.mxu3 }
 0x459   :  { %v1580_v47 = vadd.f32 %v1517_v21, %v1453_v43  ;;  %v1581_v48 = vadd.f32 %v1537_v10, %v1454_v44 }
 0x45b   :  { %v1657_v22 = vpop.f32.mrf.mxu0  ;;  %v1677_v24 = vpop.f32.mrf.mxu1 }
 0x45c   :  { %v1682_v55 = vadd.f32 %v1657_v22, %v1582_v49  ;;  %v1683_v56 = vadd.f32 %v1677_v24, %v1583_v51 }
 0x460   :  { %v1617_v25 = vpop.f32.mrf.mxu2  ;;  %v1637_v29 = vpop.f32.mrf.mxu3 }
 0x461   :  { %v1680_v52 = vadd.f32 %v1617_v25, %v1580_v47  ;;  %v1681_v19 = vadd.f32 %v1637_v29, %v1581_v48 }
 0x463   :  { %v1784_v30 = vpop.f32.mrf.mxu0  ;;  %v1804_v14 = vpop.f32.mrf.mxu1 }
 0x464   :  { %v1809_v58 = vadd.f32 %v1784_v30, %v1682_v55  ;;  %v1810_v50 = vadd.f32 %v1804_v14, %v1683_v56 }
 0x468   :  { %v1744_v31 = vpop.f32.mrf.mxu2  ;;  %v1764_v26 = vpop.f32.mrf.mxu3 }
 0x469   :  { %v1807_v11 = vadd.f32 %v1744_v31, %v1680_v52  ;;  %v1808_v57 = vadd.f32 %v1764_v26, %v1681_v19 }
 0x46b   :  { %v1911_v16 = vpop.f32.mrf.mxu0  ;;  %v1931_v32 = vpop.f32.mrf.mxu1 }
 0x46c   :  { %v1936_v60 = vadd.f32 %v1911_v16, %v1809_v58  ;;  %v1937_v38 = vadd.f32 %v1931_v32, %v1810_v50 }
 0x470   :  { %v1871_v35 = vpop.f32.mrf.mxu2  ;;  %v1891_v36 = vpop.f32.mrf.mxu3 }
 0x471   :  { %v1934_v37 = vadd.f32 %v1871_v35, %v1807_v11  ;;  %v1935_v59 = vadd.f32 %v1891_v36, %v1808_v57 }
 0x473   :  { %v2038_v54 = vpop.f32.mrf.mxu0  ;;  %v2058_v23 = vpop.f32.mrf.mxu1 }
 0x474   :  { %v2063_v3 = vadd.f32 %v2038_v54, %v1936_v60  ;;  %v2064_v4 = vadd.f32 %v2058_v23, %v1937_v38 }
 0x478   :  { %v1998_v40 = vpop.f32.mrf.mxu2  ;;  %v2018_v15 = vpop.f32.mrf.mxu3 }
 0x479   :  { %v2061_v28 = vadd.f32 %v1998_v40, %v1934_v37  ;;  %v2062_v61 = vadd.f32 %v2018_v15, %v1935_v59 }
 0x480   :  { %v2125_v62 = vpop.f32.mrf.mxu2  ;;  %v2145_v0 = vpop.f32.mrf.mxu3 }
 0x481   :  { %v2188_v63 = vadd.f32 %v2125_v62, %v2061_v28  ;;  %v2189_v5 = vadd.f32 %v2145_v0, %v2062_v61 }
 0x482   :  { %v2165_v6 = vpop.f32.mrf.mxu0  ;;  %v2185_v45 = vpop.f32.mrf.mxu1 }
 0x483   :  { %v2192_v39 = vmax.f32 %v2188_v63, 0.0  ;;  %v2193_v7 = vmax.f32 %v2189_v5, 0.0  ;;  %v2190_v17 = vadd.f32 %v2165_v6, %v2063_v3  ;;  %v2191_v12 = vadd.f32 %v2185_v45, %v2064_v4 }
 0x485   :  { %v2194_v8 = vmax.f32 %v2190_v17, 0.0  ;;  %v2195_v9 = vmax.f32 %v2191_v12, 0.0  ;;  %2517 = vmatpush.msk.msrb.mxu2 %vm92_vm0, %v2192_v39  ;;  %2519 = vmatpush.msk.msrb.mxu3 %vm92_vm0, %v2193_v7 }
 0x486   :  { %2518 = vmatmul.msk.f32.vlgmr.msrb.gmra.mxu2 %vm85_vm1, %v2196_v53  ;;  %2520 = vmatmul.msk.f32.vlgmr.msrb.gmra.mxu3 %vm85_vm1, %v2196_v53 }
 0x487   :  { %2521 = vmatpush.msk.msra.mxu0 %vm92_vm0, %v2194_v8  ;;  %2523 = vmatpush.msk.msra.mxu1 %vm92_vm0, %v2195_v9 }
 0x488   :  { %2522 = vmatmul.msk.f32.vlgmr.msra.gmra.mxu0 %vm85_vm1, %v2196_v53  ;;  %2524 = vmatmul.msk.f32.vlgmr.msra.gmra.mxu1 %vm85_vm1, %v2196_v53 }
 0x505   :  { %v2275_v20 = vpop.f32.mrf.mxu0  ;;  %v2295_v27 = vpop.f32.mrf.mxu1 }
 0x506   :  { %v2276_v21 = vadd.f32 %v2275_v20, %v2201_v13  ;;  %v2296_v10 = vadd.f32 %v2295_v27, %v2201_v13 }
 0x508   :  { %v2527_v22 = vmul.f32 -1.442695, %v2276_v21  ;;  %v2528_v24 = vmul.f32 -1.442695, %v2296_v10 }
 0x509   :  { %v2235_v25 = vpop.f32.mrf.mxu2  ;;  %v2255_v29 = vpop.f32.mrf.mxu3 }
 0x50a   :  { %2551 = vpow2.f32 %v2527_v22  ;;  %v2236_v30 = vadd.f32 %v2235_v25, %v2201_v13  ;;  %v2256_v14 = vadd.f32 %v2255_v29, %v2201_v13 }
 0x50b   :  { %2553 = vpow2.f32 %v2528_v24 }
 0x50c   :  { %v2525_v31 = vmul.f32 -1.442695, %v2236_v30  ;;  %v2526_v26 = vmul.f32 -1.442695, %v2256_v14 }
 0x50e   :  { %2555 = vpow2.f32 %v2525_v31 }
 0x50f   :  { %2557 = vpow2.f32 %v2526_v26 }
 0x510   :  { %v2552_v16 = vpop.eup %2551 }
 0x511   :  { %v2554_v32 = vpop.eup %2553  ;;  %v2312_v35 = vadd.f32 1.0, %v2552_v16 }
 0x512   :  { %v2313_v36 = vadd.f32 1.0, %v2554_v32 }
 0x513   :  { %2559 = vrcp.f32 %v2312_v35  ;;  %v2355_v48 = vand.u32 2147483648, %v2312_v35  ;;  %v2353_v40 = vand.u32 2147483647, %v2312_v35  ;;  %vm2349_vm1 = vweird.f32 %v2312_v35 }
 0x514   :  { %v2556_v18 = vpop.eup %2555  ;;  %2561 = vrcp.f32 %v2313_v36  ;;  %v2368_v51 = vand.u32 2147483647, %v2313_v36  ;;  %v2370_v52 = vand.u32 2147483648, %v2313_v36  ;;  %vm2364_vm5 = vweird.f32 %v2313_v36 }
 0x515   :  { %v2558_v41 = vpop.eup %2557  ;;  %v2310_v33 = vadd.f32 1.0, %v2556_v18  ;;  %vm3282_vm7 = vcmp.eq.f32.partialorder %v2353_v40, 8.507059e+37  ;;  %v2356_v50 = vor.u32 1.1754944e-38, %v2355_v48 }
 0x516   :  { %v2311_v42 = vadd.f32 1.0, %v2558_v41  ;;  %v2371_v37 = vor.u32 1.1754944e-38, %v2370_v52  ;;  %vm2369_vm9 = vcmp.eq.f32.partialorder %v2368_v51, 8.507059e+37 }
 0x517   :  { %2563 = vrcp.f32 %v2310_v33  ;;  %vm2319_vm13 = vweird.f32 %v2310_v33  ;;  %v2325_v63 = vand.u32 2147483648, %v2310_v33  ;;  %v2323_v39 = vand.u32 2147483647, %v2310_v33 }
 0x518   :  { %2565 = vrcp.f32 %v2311_v42  ;;  %v2338_v61 = vand.u32 2147483647, %v2311_v42  ;;  %v2340_v62 = vand.u32 2147483648, %v2311_v42  ;;  %vm2334_vm14 = vweird.f32 %v2311_v42 }
 0x519   :  { %v2560_v43 = vpop.eup %2559  ;;  %v2326_v20 = vor.u32 1.1754944e-38, %v2325_v63 }
 0x51a   :  { %v2562_v44 = vpop.eup %2561  ;;  %v2345_v46 = vmul.f32 %v2560_v43, %v2312_v35  ;;  %vm2350_vm4 = vweird.f32 %v2560_v43  ;;  %v2341_v12 = vor.u32 1.1754944e-38, %v2340_v62  ;;  %vm2339_vm3 = vcmp.eq.f32.partialorder %v2338_v61, 8.507059e+37 }
 0x51b   :  { %v2360_v34 = vmul.f32 %v2562_v44, %v2313_v36  ;;  %vm2365_vm6 = vweird.f32 %v2562_v44  ;;  %vm3286_vm8 = vmor %vm2349_vm1, %vm2350_vm4  ;;  %vm2324_vm1 = vcmp.eq.f32.partialorder %v2323_v39, 8.507059e+37 }
 0x51c   :  { %v2346_v47 = vsub.f32 1.0, %v2345_v46  ;;  %vm2366_vm10 = vmor %vm2364_vm5, %vm2365_vm6 }
 0x51d   :  { %v2564_v15 = vpop.eup %2563  ;;  %v2361_v49 = vsub.f32 1.0, %v2360_v34 }
 0x51e   :  { %v2566_v19 = vpop.eup %2565  ;;  %v2347_v54 = vmul.f32 %v2560_v43, %v2346_v47  ;;  %v2315_v23 = vmul.f32 %v2564_v15, %v2310_v33  ;;  %vm2320_vm11 = vweird.f32 %v2564_v15 }
 0x51f   :  { %v2362_v55 = vmul.f32 %v2562_v44, %v2361_v49  ;;  %v2330_v56 = vmul.f32 %v2566_v19, %v2311_v42  ;;  %vm2335_vm12 = vweird.f32 %v2566_v19  ;;  %vm3292_vm15 = vmor %vm2319_vm13, %vm2320_vm11 }
 0x520   :  { %v2316_v11 = vsub.f32 1.0, %v2315_v23  ;;  %v2348_v57 = vadd.f32 %v2560_v43, %v2347_v54  ;;  %vm2336_vm2 = vmor %vm2334_vm14, %vm2335_vm12 }
 0x521   :  { %v2331_v59 = vsub.f32 1.0, %v2330_v56  ;;  %v2363_v38 = vadd.f32 %v2562_v44, %v2362_v55 }
 0x522   :  { %v2317_v28 = vmul.f32 %v2564_v15, %v2316_v11  ;;  %v2352_v3 = vsel %vm3286_vm8, %v2560_v43, %v2348_v57 }
 0x523   :  { %v2332_v0 = vmul.f32 %v2566_v19, %v2331_v59  ;;  %v2367_v4 = vsel %vm2366_vm10, %v2562_v44, %v2363_v38  ;;  %v2357_v53 = vsel %vm3282_vm7, %v2356_v50, %v2352_v3 }
 0x524   :  { %v2318_v5 = vadd.f32 %v2564_v15, %v2317_v28  ;;  %v2372_v6 = vsel %vm2369_vm9, %v2371_v37, %v2367_v4 }
 0x525   :  { %v2333_v7 = vadd.f32 %v2566_v19, %v2332_v0  ;;  %v2379_v17 = vrot.slane %v2372_v6, 4 }
 0x526   :  { %v2322_v8 = vsel %vm3292_vm15, %v2564_v15, %v2318_v5 }
 0x527   :  { %v2337_v9 = vsel %vm2336_vm2, %v2566_v19, %v2333_v7  ;;  %v2381_v13 = vsel %vm92_vm0, %v2357_v53, %v2379_v17  ;;  %v2327_v22 = vsel %vm2324_vm1, %v2326_v20, %v2322_v8 }
 0x528   :  { %v2342_v27 = vsel %vm2339_vm3, %v2341_v12, %v2337_v9  ;;  %v2385_v21 = vmul.f32 %v2381_v13, %v2718_v2 }
 0x529   :  { %v2378_v10 = vrot.slane %v2342_v27, 4 }
 0x52a   :  { %2387 = vst [vmem:[#allocation8 + $0x8] sm:$0xff] %v2385_v21 }
 0x52b   :  { %v2380_v24 = vsel %vm92_vm0, %v2327_v22, %v2378_v10 }
 0x52c   :  { %v2384_v25 = vmul.f32 %v2380_v24, %v2716_v1 }
 0x52e   :  { %2386 = vst [vmem:[#allocation8] sm:$0xff] %v2384_v25 }
 0x52f   :  { %2398 = dma.vmem_to_hbm [thread:$0]  %s2394_s10, 256, %s2396_s13, [#allocation4]  }
 0x530   :  { %2667 = dma.done.wait [#allocation4], 256  }
 0x531   :  { %2668 = vsyncadd [#allocation4], 4294967040 }
 0x532   :  { %2403 = vsyncpa [#allocation3], 1 }
 0x533   :  { %2404 = vsyncpa [#allocation6], 1 }
 0x534   :  { %2405 = vsyncpa [#allocation4], 1 }

</bundles_post_ra>
